<compile_context>
chip_gen: v7x
topology: tpu7x:2x2x1
jax: 0.10.0
libtpu: 0.0.40
codegen_flags: <defaults>
</compile_context>

<pallas_src>
import functools

import jax
import jax.numpy as jnp
from jax import lax
from jax.experimental import pallas as pl
from jax.experimental.pallas import tpu as pltpu


_SQRT_HALF = 0.7071067811865476  # 1/sqrt(2)


def _gelu_exact(x):
    # PyTorch nn.GELU(approximate='none'): 0.5*x*(1+erf(x/sqrt(2))), in f32.
    return 0.5 * x * (1.0 + lax.erf(x * _SQRT_HALF))


def _pipeline_kernel(x_ref, w1_ref, b1_ref, w2_ref, b2_ref, g_ref, beta_ref,
                     o_ref, acc_ref, *, eps):
    """One (row-tile i, F-chunk k) step of Linear->GELU->Linear->LayerNorm."""
    k = pl.program_id(1)

    @pl.when(k == 0)
    def _init():
        acc_ref[...] = jnp.zeros_like(acc_ref)

    # ---- Linear 1 (F-chunk): (tm, H) @ (H, tf) on the MXU, f32 accumulate ----
    # Operands stay in their native dtype (e.g. bf16) — no upcast before the dot.
    h = jnp.dot(x_ref[...], w1_ref[...], preferred_element_type=jnp.float32)
    h = h + b1_ref[...].astype(jnp.float32)

    # ---- GELU (exact / erf form), f32 elementwise (VPU + EUP) ----
    h = _gelu_exact(h)

    # ---- Linear 2 partial sum: (tm, tf) @ (tf, H), accumulated in f32 ----
    acc_ref[...] += jnp.dot(h.astype(w2_ref.dtype), w2_ref[...],
                            preferred_element_type=jnp.float32)

    # ---- Epilogue on the last F-chunk: bias + LayerNorm + store ----
    @pl.when(k == pl.num_programs(1) - 1)
    def _finalize():
        y = acc_ref[...] + b2_ref[...].astype(jnp.float32)
        mean = jnp.mean(y, axis=-1, keepdims=True)
        centered = y - mean
        var = jnp.mean(centered * centered, axis=-1, keepdims=True)
        inv = lax.rsqrt(var + eps)
        normed = (centered * inv) * g_ref[...].astype(jnp.float32) \
                 + beta_ref[...].astype(jnp.float32)
        o_ref[...] = normed.astype(o_ref.dtype)


def sequential_forward(x, params, *, out_dtype=jnp.float32, tm=256, tf=512,
                       eps=1e-5):
    """Fused Linear->GELU->Linear->LayerNorm pipeline.

    x: (B, S, H) activations (any MXU-friendly dtype, e.g. bf16).
    params: dict with w1 (H,F), b1 (F,), w2 (F,H), b2 (H,), gamma (H,), beta (H,)
    tm: token tile (128/256-aligned recommended; sweep per chip generation).
    tf: FFN-chunk size (multiple of 128 recommended; must divide F, else F used).
    """
    B, S, H = x.shape
    F = params["w1"].shape[1]
    M = B * S

    # ---- tile selection ------------------------------------------------------
    tm = max(8, min(int(tm), pl.cdiv(M, 8) * 8))
    tm = (tm // 8) * 8                       # keep (8, 128) sublane alignment
    if F % tf != 0:
        # TODO(synk): pad F instead of falling back when F has no clean divisor.
        tf = F
    n_row = pl.cdiv(M, tm)
    Mp = n_row * tm
    n_f = F // tf

    x2d = x.reshape(M, H)
    if Mp != M:
        x2d = jnp.pad(x2d, ((0, Mp - M), (0, 0)))   # padded rows are sliced off

    b1 = params["b1"].reshape(1, F)
    b2 = params["b2"].reshape(1, H)
    gamma = params["gamma"].reshape(1, H)
    beta = params["beta"].reshape(1, H)

    x_bytes = x.dtype.itemsize
    w_bytes = params["w1"].dtype.itemsize
    out_bytes = jnp.dtype(out_dtype).itemsize

    # Advisory cost estimate so XLA schedules surrounding HLO sensibly.
    cost = pl.CostEstimate(
        flops=4 * Mp * H * F,                       # two GEMMs
        transcendentals=Mp * F + Mp,                # erf per GELU elem + rsqrt
        bytes_accessed=(Mp * H * x_bytes
                        + n_row * 2 * H * F * w_bytes   # weights streamed / row tile
                        + Mp * H * out_bytes),
    )

    # VMEM budget: double-buffered streaming tiles + resident f32 accumulator.
    # (Kept under v7x's 64 MiB physical VMEM; raise toward 128 MiB on v5e/v6e
    #  when sweeping larger tm/tf.)
    vmem_needed = (2 * tm * H * x_bytes                 # x row tile
                   + 2 * (H * tf + tf * H) * w_bytes    # w1 / w2 chunks
                   + 2 * 8 * tf * w_bytes               # b1 chunk (sublane pad)
                   + 3 * 2 * 8 * H * 4                  # b2 / gamma / beta
                   + 2 * tm * H * out_bytes             # output tile
                   + tm * H * 4)                        # f32 accumulator
    vmem_limit = int(min(max(vmem_needed * 4 // 3, 32 * 1024 * 1024),
                         56 * 1024 * 1024))

    kernel = functools.partial(_pipeline_kernel, eps=eps)

    out2d = pl.pallas_call(
        kernel,
        out_shape=jax.ShapeDtypeStruct((Mp, H), out_dtype),
        grid_spec=pltpu.PrefetchScalarGridSpec(
            num_scalar_prefetch=0,
            grid=(n_row, n_f),
            in_specs=[
                pl.BlockSpec((tm, H), lambda i, k: (i, 0)),   # x row-tile (held across k)
                pl.BlockSpec((H, tf), lambda i, k: (0, k)),   # w1 F-chunk
                pl.BlockSpec((1, tf), lambda i, k: (0, k)),   # b1 F-chunk
                pl.BlockSpec((tf, H), lambda i, k: (k, 0)),   # w2 F-chunk
                pl.BlockSpec((1, H), lambda i, k: (0, 0)),    # b2
                pl.BlockSpec((1, H), lambda i, k: (0, 0)),    # ln gamma
                pl.BlockSpec((1, H), lambda i, k: (0, 0)),    # ln beta
            ],
            out_specs=pl.BlockSpec((tm, H), lambda i, k: (i, 0)),
            scratch_shapes=[pltpu.VMEM((tm, H), jnp.float32)],
        ),
        compiler_params=pltpu.CompilerParams(
            dimension_semantics=("parallel", "arbitrary"),
            vmem_limit_bytes=vmem_limit),
        cost_estimate=cost,
    )(x2d, params["w1"], b1, params["w2"], b2, gamma, beta)

    return out2d[:M].reshape(B, S, H)


def init_params(key, hidden, ffn, dtype=jnp.bfloat16):
    k1, k2 = jax.random.split(key, 2)
    # Deterministic, simple init (synthetic weights — not a checkpoint load).
    w1 = (jax.random.normal(k1, (hidden, ffn), jnp.float32)
          * (1.0 / jnp.sqrt(hidden))).astype(dtype)
    b1 = jnp.zeros((ffn,), dtype)
    w2 = (jax.random.normal(k2, (ffn, hidden), jnp.float32)
          * (1.0 / jnp.sqrt(ffn))).astype(dtype)
    b2 = jnp.zeros((hidden,), dtype)
    gamma = jnp.ones((hidden,), jnp.float32)
    beta = jnp.zeros((hidden,), jnp.float32)
    return dict(w1=w1, b1=b1, w2=w2, b2=b2, gamma=gamma, beta=beta)


def reference_forward(x, params, out_dtype=jnp.float32, eps=1e-5):
    """Pure-JAX reference with the same numerics (native-dtype MXU, f32 acc)."""
    B, S, H = x.shape
    x2 = x.reshape(B * S, H)
    h = jnp.dot(x2, params["w1"], preferred_element_type=jnp.float32)
    h = h + params["b1"].astype(jnp.float32)
    h = _gelu_exact(h)
    y = jnp.dot(h.astype(params["w2"].dtype), params["w2"],
                preferred_element_type=jnp.float32)
    y = y + params["b2"].astype(jnp.float32)
    mu = jnp.mean(y, axis=-1, keepdims=True)
    var = jnp.mean((y - mu) ** 2, axis=-1, keepdims=True)
    y = (y - mu) * lax.rsqrt(var + eps) * params["gamma"].astype(jnp.float32) \
        + params["beta"].astype(jnp.float32)
    return y.reshape(B, S, H).astype(out_dtype)


if __name__ == "__main__":
    key = jax.random.PRNGKey(0)
    kx, kp = jax.random.split(key)

    # Small but lane-dense / MXU-friendly shapes: H multiple of 128, F tiled by
    # tf=256, and a token count (240) that exercises the pad-to-tile path.
    B, S, H, F = 2, 120, 128, 512
    x = jax.random.normal(kx, (B, S, H), jnp.float32).astype(jnp.bfloat16)
    params = init_params(kp, H, F, dtype=jnp.bfloat16)

    out = sequential_forward(x, params, out_dtype=jnp.float32, tm=128, tf=256)
    out = jax.block_until_ready(out)

    ref = reference_forward(x, params, out_dtype=jnp.float32)
    assert out.shape == (B, S, H) and out.dtype == jnp.float32
    max_err = float(jnp.max(jnp.abs(out - ref)))
    assert jnp.allclose(out, ref, atol=1e-2, rtol=1e-2), \
        f"mismatch vs reference (max abs err {max_err})"

    print("KERNEL_OK")
</pallas_src>

<mosaic_0001>
module attributes {stable_mosaic.version = 11 : i64} {
  func.func @_pipeline_kernel(%arg0: i32, %arg1: i32, %arg2: memref<128x128xbf16, #tpu.memory_space<vmem>>, %arg3: memref<128x256xbf16, #tpu.memory_space<vmem>>, %arg4: memref<1x256xbf16, #tpu.memory_space<vmem>>, %arg5: memref<256x128xbf16, #tpu.memory_space<vmem>>, %arg6: memref<1x128xbf16, #tpu.memory_space<vmem>>, %arg7: memref<1x128xf32, #tpu.memory_space<vmem>>, %arg8: memref<1x128xf32, #tpu.memory_space<vmem>>, %arg9: memref<128x128xf32, #tpu.memory_space<vmem>>, %arg10: memref<128x128xf32, #tpu.memory_space<vmem>>) attributes {dimension_semantics = [#tpu.dimension_semantics<parallel>, #tpu.dimension_semantics<arbitrary>], iteration_bounds = array<i64: 2, 2>, scalar_prefetch = 0 : i64, scratch_operands = 1 : i64, tpu.core_type = #tpu.core_type<tc>, window_params = [{transform_indices = @transform_0, window_bounds = array<i64: 128, 128>}, {transform_indices = @transform_1, window_bounds = array<i64: 128, 256>}, {transform_indices = @transform_2, window_bounds = array<i64: 1, 256>}, {transform_indices = @transform_3, window_bounds = array<i64: 256, 128>}, {pipeline_mode = #tpu.pipeline_mode<synchronous>, transform_indices = @transform_4, window_bounds = array<i64: 1, 128>}, {pipeline_mode = #tpu.pipeline_mode<synchronous>, transform_indices = @transform_5, window_bounds = array<i64: 1, 128>}, {pipeline_mode = #tpu.pipeline_mode<synchronous>, transform_indices = @transform_6, window_bounds = array<i64: 1, 128>}, {transform_indices = @transform_7, window_bounds = array<i64: 128, 128>}]} {
    %c0_i32 = arith.constant 0 : i32
    %0 = arith.cmpi eq, %arg1, %c0_i32 : i32
    %1 = arith.extui %0 : i1 to i32
    %c0_i32_0 = arith.constant 0 : i32
    %2 = arith.cmpi ne, %1, %c0_i32_0 : i32
    scf.if %2 {
      %cst_17 = arith.constant 0.000000e+00 : f32
      %27 = vector.broadcast %cst_17 : f32 to vector<128x128xf32>
      %c0_18 = arith.constant 0 : index
      %c0_19 = arith.constant 0 : index
      %28 = vector.load %arg10[%c0_18, %c0_19] : memref<128x128xf32, #tpu.memory_space<vmem>>, vector<128x128xf32>
      tpu.vector_store %arg10[%c0_18, %c0_19], %27 {strides = array<i32>} : memref<128x128xf32, #tpu.memory_space<vmem>>, vector<128x128xf32>,
    } else {
    }
    %c0 = arith.constant 0 : index
    %c0_1 = arith.constant 0 : index
    %3 = vector.load %arg2[%c0, %c0_1] : memref<128x128xbf16, #tpu.memory_space<vmem>>, vector<128x128xbf16>
    %c0_2 = arith.constant 0 : index
    %c0_3 = arith.constant 0 : index
    %4 = vector.load %arg3[%c0_2, %c0_3] : memref<128x256xbf16, #tpu.memory_space<vmem>>, vector<128x256xbf16>
    %cst = arith.constant dense<0.000000e+00> : vector<128x256xf32>
    %5 = tpu.matmul %3, %4, %cst {dimension_numbers = #tpu.dot_dimension_numbers<[1], [0], [0], [1], [0, 0, 1, 1], [], []>} : vector<128x128xbf16>, vector<128x256xbf16>, vector<128x256xf32> -> vector<128x256xf32>
    %c0_4 = arith.constant 0 : index
    %c0_5 = arith.constant 0 : index
    %6 = vector.load %arg4[%c0_4, %c0_5] : memref<1x256xbf16, #tpu.memory_space<vmem>>, vector<1x256xbf16>
    %7 = arith.extf %6 : vector<1x256xbf16> to vector<1x256xf32>
    %8 = vector.broadcast %7 : vector<1x256xf32> to vector<128x256xf32>
    %9 = arith.addf %5, %8 : vector<128x256xf32>
    %cst_6 = arith.constant 5.000000e-01 : f32
    %10 = vector.broadcast %cst_6 : f32 to vector<128x256xf32>
    %11 = arith.mulf %10, %9 : vector<128x256xf32>
    %cst_7 = arith.constant 0.707106769 : f32
    %12 = vector.broadcast %cst_7 : f32 to vector<128x256xf32>
    %13 = arith.mulf %9, %12 : vector<128x256xf32>
    %14 = math.erf %13 : vector<128x256xf32>
    %cst_8 = arith.constant 1.000000e+00 : f32
    %15 = vector.broadcast %cst_8 : f32 to vector<128x256xf32>
    %16 = arith.addf %15, %14 : vector<128x256xf32>
    %17 = arith.mulf %11, %16 : vector<128x256xf32>
    %c0_9 = arith.constant 0 : index
    %c0_10 = arith.constant 0 : index
    %18 = vector.load %arg10[%c0_9, %c0_10] : memref<128x128xf32, #tpu.memory_space<vmem>>, vector<128x128xf32>
    %19 = arith.truncf %17 : vector<128x256xf32> to vector<128x256xbf16>
    %c0_11 = arith.constant 0 : index
    %c0_12 = arith.constant 0 : index
    %20 = vector.load %arg5[%c0_11, %c0_12] : memref<256x128xbf16, #tpu.memory_space<vmem>>, vector<256x128xbf16>
    %cst_13 = arith.constant dense<0.000000e+00> : vector<128x128xf32>
    %21 = tpu.matmul %19, %20, %cst_13 {dimension_numbers = #tpu.dot_dimension_numbers<[1], [0], [0], [1], [0, 0, 1, 1], [], []>} : vector<128x256xbf16>, vector<256x128xbf16>, vector<128x128xf32> -> vector<128x128xf32>
    %22 = arith.addf %18, %21 : vector<128x128xf32>
    %c0_14 = arith.constant 0 : index
    %c0_15 = arith.constant 0 : index
    %23 = vector.load %arg10[%c0_14, %c0_15] : memref<128x128xf32, #tpu.memory_space<vmem>>, vector<128x128xf32>
    tpu.vector_store %arg10[%c0_14, %c0_15], %22 {strides = array<i32>} : memref<128x128xf32, #tpu.memory_space<vmem>>, vector<128x128xf32>,
    %c1_i32 = arith.constant 1 : i32
    %24 = arith.cmpi eq, %arg1, %c1_i32 : i32
    %25 = arith.extui %24 : i1 to i32
    %c0_i32_16 = arith.constant 0 : i32
    %26 = arith.cmpi ne, %25, %c0_i32_16 : i32
    scf.if %26 {
      %c0_17 = arith.constant 0 : index
      %c0_18 = arith.constant 0 : index
      %27 = vector.load %arg10[%c0_17, %c0_18] : memref<128x128xf32, #tpu.memory_space<vmem>>, vector<128x128xf32>
      %c0_19 = arith.constant 0 : index
      %c0_20 = arith.constant 0 : index
      %28 = vector.load %arg6[%c0_19, %c0_20] : memref<1x128xbf16, #tpu.memory_space<vmem>>, vector<1x128xbf16>
      %29 = arith.extf %28 : vector<1x128xbf16> to vector<1x128xf32>
      %30 = vector.broadcast %29 : vector<1x128xf32> to vector<128x128xf32>
      %31 = arith.addf %27, %30 : vector<128x128xf32>
      %cst_21 = arith.constant dense<0.000000e+00> : vector<128xf32>
      %32 = vector.multi_reduction <add>, %31, %cst_21 [1] : vector<128x128xf32> to vector<128xf32>
      %33 = vector.shape_cast %32 : vector<128xf32> to vector<128x1xf32>
      %cst_22 = arith.constant 1.280000e+02 : f32
      %34 = vector.broadcast %cst_22 : f32 to vector<128x1xf32>
      %35 = arith.divf %33, %34 : vector<128x1xf32>
      %36 = vector.broadcast %35 : vector<128x1xf32> to vector<128x128xf32>
      %37 = arith.subf %31, %36 : vector<128x128xf32>
      %38 = arith.mulf %37, %37 : vector<128x128xf32>
      %cst_23 = arith.constant dense<0.000000e+00> : vector<128xf32>
      %39 = vector.multi_reduction <add>, %38, %cst_23 [1] : vector<128x128xf32> to vector<128xf32>
      %40 = vector.shape_cast %39 : vector<128xf32> to vector<128x1xf32>
      %cst_24 = arith.constant 1.280000e+02 : f32
      %41 = vector.broadcast %cst_24 : f32 to vector<128x1xf32>
      %42 = arith.divf %40, %41 : vector<128x1xf32>
      %cst_25 = arith.constant 9.99999974E-6 : f32
      %43 = vector.broadcast %cst_25 : f32 to vector<128x1xf32>
      %44 = arith.addf %42, %43 : vector<128x1xf32>
      %45 = math.rsqrt %44 : vector<128x1xf32>
      %46 = vector.broadcast %45 : vector<128x1xf32> to vector<128x128xf32>
      %47 = arith.mulf %37, %46 : vector<128x128xf32>
      %c0_26 = arith.constant 0 : index
      %c0_27 = arith.constant 0 : index
      %48 = vector.load %arg7[%c0_26, %c0_27] : memref<1x128xf32, #tpu.memory_space<vmem>>, vector<1x128xf32>
      %49 = vector.broadcast %48 : vector<1x128xf32> to vector<128x128xf32>
      %50 = arith.mulf %47, %49 : vector<128x128xf32>
      %c0_28 = arith.constant 0 : index
      %c0_29 = arith.constant 0 : index
      %51 = vector.load %arg8[%c0_28, %c0_29] : memref<1x128xf32, #tpu.memory_space<vmem>>, vector<1x128xf32>
      %52 = vector.broadcast %51 : vector<1x128xf32> to vector<128x128xf32>
      %53 = arith.addf %50, %52 : vector<128x128xf32>
      %c0_30 = arith.constant 0 : index
      %c0_31 = arith.constant 0 : index
      %54 = vector.load %arg9[%c0_30, %c0_31] : memref<128x128xf32, #tpu.memory_space<vmem>>, vector<128x128xf32>
      tpu.vector_store %arg9[%c0_30, %c0_31], %53 {strides = array<i32>} : memref<128x128xf32, #tpu.memory_space<vmem>>, vector<128x128xf32>,
    } else {
    }
    return
  }
  func.func @transform_0(%arg0: i32, %arg1: i32) -> (i32, i32) {
    %c0_i32 = arith.constant 0 : i32
    %c0_i32_0 = arith.constant 0 : i32
    return %arg0, %c0_i32 : i32, i32
  }
  func.func @transform_1(%arg0: i32, %arg1: i32) -> (i32, i32) {
    %c0_i32 = arith.constant 0 : i32
    %c0_i32_0 = arith.constant 0 : i32
    return %c0_i32, %arg1 : i32, i32
  }
  func.func @transform_2(%arg0: i32, %arg1: i32) -> (i32, i32) {
    %c0_i32 = arith.constant 0 : i32
    %c0_i32_0 = arith.constant 0 : i32
    return %c0_i32, %arg1 : i32, i32
  }
  func.func @transform_3(%arg0: i32, %arg1: i32) -> (i32, i32) {
    %c0_i32 = arith.constant 0 : i32
    %c0_i32_0 = arith.constant 0 : i32
    return %arg1, %c0_i32 : i32, i32
  }
  func.func @transform_4(%arg0: i32, %arg1: i32) -> (i32, i32) {
    %c0_i32 = arith.constant 0 : i32
    %c0_i32_0 = arith.constant 0 : i32
    %c0_i32_1 = arith.constant 0 : i32
    return %c0_i32, %c0_i32_0 : i32, i32
  }
  func.func @transform_5(%arg0: i32, %arg1: i32) -> (i32, i32) {
    %c0_i32 = arith.constant 0 : i32
    %c0_i32_0 = arith.constant 0 : i32
    %c0_i32_1 = arith.constant 0 : i32
    return %c0_i32, %c0_i32_0 : i32, i32
  }
  func.func @transform_6(%arg0: i32, %arg1: i32) -> (i32, i32) {
    %c0_i32 = arith.constant 0 : i32
    %c0_i32_0 = arith.constant 0 : i32
    %c0_i32_1 = arith.constant 0 : i32
    return %c0_i32, %c0_i32_0 : i32, i32
  }
  func.func @transform_7(%arg0: i32, %arg1: i32) -> (i32, i32) {
    %c0_i32 = arith.constant 0 : i32
    %c0_i32_0 = arith.constant 0 : i32
    return %arg0, %c0_i32 : i32, i32
  }
}

</mosaic_0001>

<bundles_post_ra>
// kernel: tpu_custom_call.1
= control target key start
LH: loop header
LB: loop body
LE: loop exit
PB: predicated region body
PF: predicated region fallthrough
CT: control target
= control target key end

     0   :  { %s2963_s0 = inlined_call_operand.hbm [shape: bf16[256,128], index: 0, kind: input, shape index: {}]   ;;  %s2964_s1 = inlined_call_operand.hbm [shape: bf16[128,512], index: 1, kind: input, shape index: {}]   ;;  %s2965_s2 = inlined_call_operand.vmem [shape: bf16[1,512], index: 2, kind: input, shape index: {}]   ;;  %s2966_s3 = inlined_call_operand.hbm [shape: bf16[512,128], index: 3, kind: input, shape index: {}]   ;;  %s2967_s4 = inlined_call_operand.vmem [shape: bf16[1,128], index: 4, kind: input, shape index: {}]   ;;  %s2968_s5 = inlined_call_operand.vmem [shape: f32[1,128], index: 5, kind: input, shape index: {}]   ;;  %s2969_s6 = inlined_call_operand.vmem [shape: f32[1,128], index: 6, kind: input, shape index: {}]   ;;  %s2970_s7 = inlined_call_operand.hbm [shape: f32[256,128], index: 7, kind: output, shape index: {}]  }
   0x1   :  { %2983 = sst [smem:[#allocation21_spill]] %s2964_s1 }
   0x2   :  { %2984 = sst [smem:[#allocation22_spill]] %s2967_s4 }
   0x3   :  { %2985 = sst [smem:[#allocation23_spill]] %s2968_s5 }
   0x4   :  { %2986 = sst [smem:[#allocation24_spill]] %s2969_s6 }
   0x5   :  { %2987 = sst [smem:[#allocation25_spill]] %s2970_s7 }
   0x6   :  { %12 = vsyncpa [#allocation4], 0 }
   0x7   :  { %14 = vsyncpa [#allocation4 + $0x1], 0 }
   0x8   :  { %15 = vsyncpa [#allocation7], 0 }
   0x9   :  { %17 = vsyncpa [#allocation7 + $0x1], 0 }
   0xa   :  { %18 = vsyncpa [#allocation5], 0 }
   0xb   :  { %20 = vsyncpa [#allocation5 + $0x1], 0  ;;  %s2276_s24 = smov 0   ;;  %s2278_s25 = smov 0  }
   0xc   :  { %s2280_s26 = smov 0   ;;  %s2282_s27 = smov 0  }
   0xd   :  { %s2284_s28 = smov 0   ;;  %s2286_s29 = smov 0  }
   0xe   :  { %s2288_s30 = smov 0   ;;  %s2290_s8 = smov 0  }
   0xf   :  { %s2292_s9 = smov 0   ;;  %s2294_s10 = smov 0  }
  0x10   :  { %s2296_s11 = smov 0  }
  0x11 LB: > { %2988 = sst [smem:[#allocation13_spill]] %s2189_s26  ;;  %s35_s12 = sadd.s32 1, %s2213_s9  ;;  %s2221_s11 = sphi %s2296_s11, %s26_s11   ;;  %s2217_s10 = sphi %s2294_s10, %s3028_s10   ;;  %s2213_s9 = sphi %s2292_s9, %s3034_s9   ;;  %s2209_s8 = sphi %s2290_s8, %s3026_s8   ;;  %s2205_s30 = sphi %s2288_s30, %s3033_s30   ;;  %s2201_s29 = sphi %s2286_s29, %s3025_s29   ;;  %s2197_s28 = sphi %s2284_s28, %s3032_s28   ;;  %s2193_s27 = sphi %s2282_s27, %s3031_s27   ;;  %s2189_s26 = sphi %s2280_s26, %s3023_s26   ;;  %s2185_s25 = sphi %s2278_s25, %s3030_s25   ;;  %s2181_s24 = sphi %s2276_s24, %s3029_s24  }
  0x12   : > { %2989 = sst [smem:[#allocation14_spill]] %s2201_s29  ;;  %p2974_p0 = scmp.eq.s32.totalorder %s2221_s11, 0 }
  0x13   : > { %2990 = sst [smem:[#allocation15_spill]] %s2209_s8  ;;  %p2333_p1 = scmp.ge.s32.totalorder %s35_s12, 2 }
  0x14   : > { %2991 = sst [smem:[#allocation16_spill]] %s2217_s10  ;;  %s71_s14 = sadd.s32 1, %s2189_s26 }
  0x15   : > { %p78_p2 = scmp.ne.s32.totalorder %s2189_s26, %s2185_s25  ;;  %s3036_s12 = smov (%p2333_p1, %s35_s12), 0 }
  0x16   : > { %2993 = sst [smem:[#allocation17_spill]] %s3036_s12  ;;  %s68_s15 = ssub.s32 %s2213_s9, %s3036_s12 }
  0x17   : > { %p80_p4 = por %p78_p2, %p2974_p0  ;;  %p2973_p5 = scmp.lt.s32.totalorder %s2221_s11, 4 }
  0x18   : > { %p69_p6 = scmp.eq.s32.totalorder %s68_s15, 0  ;;  %s279_s16 = sand.u32 1, %s2221_s11  }
  0x19   : > { %s281_s17 = sand.u32 1, %s2189_s26   ;;  %s1673_s20 = sshll.u32 %s2213_s9, 7 }
  0x1a   : > { %s2354_s18 = scalar_select %p69_p6, %s2189_s26, %s71_s14  }
  0x1b   : > { %s2356_s19 = sshll.u32 %s281_s17, 7  ;;  %s2995_s1 = sld [smem:[#allocation21_spill]] }
  0x1c   : > { %2994 = sst [smem:[#allocation18_spill]] %s2354_s18  ;;  %s283_s12 = scalar_lea.vmem [#allocation6], %s2356_s19 }
  0x1d   : > { %s290_s7 = sshll.u32 %s283_s12, 4  ;;  %p2367_p7 = pnand %p2973_p5, %p80_p4  ;;  %s2371_s7 = int_to_ptr.vmem [resolvable:$true] %s290_s7 }
  0x1e   : > { %s2374_s14 = scalar_lea.sflag [#allocation7], %s279_s16 }
  0x1f   : > { %p2975_p10 = pneg %p2367_p7 }
  0x21   : > { %s2362_s23 = scalar_lea.hbm %s2995_s1, %s1673_s20  ;;  %s2010_s21 = scalar_lea.hbm %s2995_s1, 4096 }
  0x22   : > { %s2005_s17 = scalar_lea.hbm %s2362_s23, 2048  ;;  %p2011_p13 = scmp.lt.u32.totalorder %s2362_s23, %s2995_s1 }
  0x23   : > { %p2006_p9 = scmp.ne.s32.totalorder %s2362_s23, %s2005_s17  ;;  %p2012_p2 = scmp.lt.u32.totalorder %s2010_s21, %s2005_s17 }
  0x24   : > { %p2014_p6 = scmp.lt.u32.totalorder %s2005_s17, %s2362_s23 }
  0x25   : > { %p2008_p11 = pnand %p2975_p10, %p2006_p9  ;;  %p2013_p4 = por %p2012_p2, %p2011_p13 }
  0x27   : > { %p2009_p12 = pneg %p2008_p11  ;;  %p2015_p5 = por %p2014_p6, %p2013_p4 }
  0x29   : > { %p2016_p3 = pnand %p2015_p5, %p2009_p12 }
  0x2b   : > { %2019 = shalt.err (!%p2016_p3)
}
  0x2c   : > { %s2020_s16 = scalar_lea.vmem %s2371_s7, 2048  ;;  %s2223_s12 = smov [#allocation6]  }
  0x2d   : > { %p2021_p9 = scmp.ne.s32.totalorder %s2371_s7, %s2020_s16  ;;  %s2025_s20 = sshll.u32 %s2223_s12, 4  ;;  %s2026_s20 = int_to_ptr.vmem [resolvable:$false] %s2025_s20 }
  0x2e   : > { %s2027_s18 = scalar_lea.vmem %s2026_s20, 4096  ;;  %p2028_p8 = scmp.lt.s32.totalorder %s2371_s7, %s2026_s20 }
  0x2f   : > { %p2023_p11 = pnand %p2021_p9, %p2975_p10  ;;  %p2029_p13 = scmp.lt.s32.totalorder %s2027_s18, %s2020_s16 }
  0x31   : > { %p2024_p0 = pneg %p2023_p11  ;;  %p2030_p2 = por %p2029_p13, %p2028_p8 }
  0x33   : > { %p2031_p4 = pnand %p2030_p2, %p2024_p0 }
  0x35   : > { %2034 = shalt.err (!%p2031_p4)
}
  0x36   : > { %s2224_s17 = smov 256   ;;  %s2225_s21 = smov 128  }
  0x37   : > { %s2226_s22 = smov 8   ;;  %p327_p0 = scmp.lt.s32.totalorder %s2221_s11, 5 }
  0x38   : > { %1754 = dma.hbm_to_vmem [thread:$0]  (!%p2367_p7), %s2362_s23, 2048, %s2371_s7, %s2374_s14, %s2224_s17, %s2225_s21, %s2226_s22  }
  0x39   : > { %p2997_p3 = scmp.ge.s32.totalorder %s2221_s11, 1  ;;  %s2410_s12 = sadd.s32 4294967295, %s2221_s11  }
  0x3a   : > { %s1605_s20 = sadd.s32 4294967294, %s2221_s11   ;;  %s38_s18 = sadd.s32 1, %s2217_s10 }
  0x3b   : > { %p2405_p5 = pnand %p2997_p3, %p327_p0  ;;  %s45_s1 = sadd.s32 1, %s2201_s29 }
  0x3c   : > { %s3038_s18 = smov (!%p2333_p1, %s38_s18), %s2217_s10  ;;  %p52_p8 = scmp.ne.s32.totalorder %s2201_s29, %s2197_s28 }
  0x3d   : > { %s2998_s16 = scalar_select %p2405_p5, 1, 0 }
  0x3e   : > { %p58_p12 = scmp.ne.s32.totalorder %s2197_s28, %s2193_s27  ;;  %p40_p6 = scmp.ge.s32.totalorder %s3038_s18, 2 }
  0x3f   : > { %p59_p9 = scmp.eq.s32.totalorder %s2410_s12, 0  ;;  %p2999_p11 = scmp.eq.s32.totalorder %s2221_s11, 0 }
  0x40   : > { %p223_p2 = scmp.eq.s32.totalorder %s2410_s12, 3  ;;  %s3040_s18 = smov (%p40_p6, %s3038_s18), 0 }
  0x41   : > { %p2425_p13 = por %p2999_p11, %p52_p8  ;;  %3001 = sst [smem:[#allocation19_spill]] %s3040_s18 }
  0x42   : > { %p2435_p1 = por %p59_p9, %p58_p12  ;;  %p3003_p4 = scmp.ne.s32.totalorder %s2185_s25, %s2181_s24 }
  0x43   : > { %s42_s17 = ssub.s32 %s2217_s10, %s3040_s18  ;;  %p2448_p3 = por %p223_p2, %p52_p8 }
  0x44   : > { %s3002_s13 = scalar_select %p2435_p1, 1, 0 }
  0x45   : > { %p2442_p0 = por %p3003_p4, %p59_p9  ;;  %p43_p11 = scmp.eq.s32.totalorder %s42_s17, 0 }
  0x46   : > { %s3005_s21 = scalar_select %p2448_p3, 1, 0 }
  0x47   : > { %s3004_s23 = scalar_select %p2442_p0, 1, 0 }
  0x48   : > { %p229_p10 = scmp.eq.s32.totalorder %s1605_s20, 3  ;;  %s258_s22 = sand.u32 1, %s2201_s29  }
  0x49   : > { %s1672_s26 = sshll.u32 %s2217_s10, 10  ;;  %s1608_s24 = sshll.u32 %s258_s22, 6 }
  0x4a   : > { %s2455_s8 = scalar_select %p43_p11, %s2201_s29, %s45_s1  }
  0x4b   : > { %p2460_p6 = por %p229_p10, %p58_p12  ;;  %s2467_s18 = scalar_lea.hbm %s2963_s0, %s1672_s26 }
  0x4c   : > { %3006 = sst [smem:[#allocation20_spill]] %s2455_s8  ;;  %p3008_p8 = scmp.lt.s32.totalorder %s2221_s11, 4 }
  0x4d   : > { %s3007_s6 = scalar_select %p2460_p6, 1, 0 }
  0x4e   : > { %p2473_p9 = pnand %p3008_p8, %p2425_p13  ;;  %s262_s20 = scalar_lea.vmem [#allocation3], %s1608_s24 }
  0x4f   : > { %s269_s17 = sshll.u32 %s262_s20, 4  ;;  %s2479_s10 = scalar_lea.sflag [#allocation4], %s258_s22  ;;  %s2477_s17 = int_to_ptr.vmem [resolvable:$true] %s269_s17 }
  0x50   : > { %s2035_s4 = scalar_lea.hbm %s2467_s18, 1024  ;;  %p2037_p12 = pneg %p2473_p9 }
  0x51   : > { %p2036_p10 = scmp.ne.s32.totalorder %s2467_s18, %s2035_s4  ;;  %s2040_s7 = scalar_lea.hbm %s2963_s0, 2048 }
  0x52   : > { %p2041_p13 = scmp.lt.u32.totalorder %s2467_s18, %s2963_s0  ;;  %p2042_p11 = scmp.lt.u32.totalorder %s2040_s7, %s2035_s4 }
  0x53   : > { %p2038_p2 = pnand %p2037_p12, %p2036_p10  ;;  %p2044_p6 = scmp.lt.u32.totalorder %s2035_s4, %s2467_s18 }
  0x54   : > { %p2043_p8 = por %p2042_p11, %p2041_p13 }
  0x55   : > { %p2039_p4 = pneg %p2038_p2 }
  0x56   : > { %p2045_p3 = por %p2044_p6, %p2043_p8 }
  0x58   : > { %p2046_p0 = pnand %p2045_p3, %p2039_p4 }
  0x5a   : > { %2049 = shalt.err (!%p2046_p0)
}
  0x5b   : > { %s2050_s22 = scalar_lea.vmem %s2477_s17, 1024  ;;  %s2227_s24 = smov [#allocation3]  }
  0x5c   : > { %p2051_p10 = scmp.ne.s32.totalorder %s2477_s17, %s2050_s22  ;;  %s2055_s20 = sshll.u32 %s2227_s24, 4  ;;  %s2056_s20 = int_to_ptr.vmem [resolvable:$false] %s2055_s20 }
  0x5d   : > { %s2057_s29 = scalar_lea.vmem %s2056_s20, 2048  ;;  %p2058_p5 = scmp.lt.s32.totalorder %s2477_s17, %s2056_s20 }
  0x5e   : > { %p2053_p2 = pnand %p2051_p10, %p2037_p12  ;;  %p2059_p13 = scmp.lt.s32.totalorder %s2057_s29, %s2050_s22 }
  0x60   : > { %p2054_p1 = pneg %p2053_p2  ;;  %p2060_p11 = por %p2059_p13, %p2058_p5 }
  0x62   : > { %p2061_p6 = pnand %p2060_p11, %p2054_p1 }
  0x64   : > { %2064 = shalt.err (!%p2061_p6)
}
  0x65   : > { %s2228_s8 = smov 64   ;;  %s2229_s4 = smov 4  }
  0x66   : > { %1751 = dma.hbm_to_vmem [thread:$0]  (!%p2473_p9), %s2467_s18, 1024, %s2477_s17, %s2479_s10, %s2228_s8, %s2228_s8, %s2229_s4  }
  0x67   : > { %s1674_s5 = sshll.u32 %s2213_s9, 11  ;;  %s312_s26 = scalar_lea.vmem [#allocation8], %s2356_s19 }
  0x68   : > { %s319_s7 = sshll.u32 %s312_s26, 4  ;;  %s2515_s20 = scalar_lea.hbm %s2966_s3, %s1674_s5  ;;  %s2517_s7 = int_to_ptr.vmem [resolvable:$true] %s319_s7 }
  0x69   : > { %s2065_s29 = scalar_lea.hbm %s2515_s20, 2048  ;;  %p3010_p1 = pneg %p2367_p7 }
  0x6a   : > { %p2066_p5 = scmp.ne.s32.totalorder %s2515_s20, %s2065_s29  ;;  %s2070_s18 = scalar_lea.hbm %s2966_s3, 4096 }
  0x6b   : > { %p2071_p9 = scmp.lt.u32.totalorder %s2515_s20, %s2966_s3  ;;  %p2072_p12 = scmp.lt.u32.totalorder %s2070_s18, %s2065_s29 }
  0x6c   : > { %p2068_p0 = pnand %p2066_p5, %p3010_p1  ;;  %p2074_p8 = scmp.lt.u32.totalorder %s2065_s29, %s2515_s20 }
  0x6d   : > { %p2073_p4 = por %p2072_p12, %p2071_p9 }
  0x6e   : > { %p2069_p3 = pneg %p2068_p0 }
  0x6f   : > { %p2075_p10 = por %p2074_p8, %p2073_p4 }
  0x71   : > { %p2076_p2 = pnand %p2075_p10, %p2069_p3 }
  0x73   : > { %2079 = shalt.err (!%p2076_p2)
}
  0x74   : > { %s2080_s5 = scalar_lea.vmem %s2517_s7, 2048  ;;  %p3011_p11 = pmov %p3010_p1 }
  0x75   : > { %p2081_p13 = scmp.ne.s32.totalorder %s2517_s7, %s2080_s5  ;;  %s2230_s26 = smov [#allocation8]  }
  0x76   : > { %s2085_s22 = sshll.u32 %s2230_s26, 4  ;;  %s2086_s22 = int_to_ptr.vmem [resolvable:$false] %s2085_s22 }
  0x77   : > { %p2083_p6 = pnand %p2081_p13, %p3011_p11  ;;  %s2087_s24 = scalar_lea.vmem %s2086_s22, 4096 }
  0x78   : > { %p2088_p1 = scmp.lt.s32.totalorder %s2517_s7, %s2086_s22  ;;  %p2089_p0 = scmp.lt.s32.totalorder %s2087_s24, %s2080_s5 }
  0x79   : > { %p2084_p5 = pneg %p2083_p6 }
  0x7a   : > { %p2090_p9 = por %p2089_p0, %p2088_p1 }
  0x7c   : > { %p2091_p12 = pnand %p2090_p9, %p2084_p5 }
  0x7e   : > { %2094 = shalt.err (!%p2091_p12)
}
  0x7f   : > { %1757 = dma.hbm_to_vmem [thread:$0]  (!%p2367_p7), %s2515_s20, 2048, %s2517_s7, %s2374_s14, %s2228_s8, %s2228_s8, %s2229_s4  }
  0x80   : > { %p3012_p3 = scmp.ne.s32.totalorder %s2998_s16, 0 }
  0x81   : > { %s2549_s29 = sand.u32 (!%p3012_p3), 1, %s2197_s28   ;;  %p3013_p4 = scmp.ne.s32.totalorder (!%p3012_p3), %s3002_s13, 0 }
  0x82   : > { %331 = sbr.rel (%p3012_p3) target bundleno = 1050 (0x41a), region = 48  ;;  %s1618_s10 = sshll.u32 (!%p3012_p3), %s2549_s29, 6 }
  0x83   : > { %s334_s19 = scalar_lea.sflag (!%p3012_p3), [#allocation4], %s2549_s29  ;;  %s2553_s18 = scalar_lea.vmem (!%p3012_p3), [#allocation3], %s1618_s10 }
  0x89   : > { %2168 = dma.done.wait (%p3013_p4), %s334_s19, 1024  }
  0x8a   : > { %2170 = vsyncadd (%p3013_p4), %s334_s19, 4294966272  ;;  %s342_s15 = sand.u32 1, %s2410_s12   ;;  %s344_s14 = sand.u32 1, %s2185_s25  }
  0x8b   : > { %s1619_s16 = sshll.u32 %s344_s14, 7  ;;  %s343_s8 = scalar_lea.sflag [#allocation7], %s342_s15 }
  0x8c   : > { %s2561_s4 = scalar_lea.vmem [#allocation6], %s1619_s16  ;;  %p3014_p7 = scmp.ne.s32.totalorder %s3004_s23, 0 }
  0x8e   : > { %2172 = dma.done.wait (%p3014_p7), %s343_s8, 4096  }
  0x8f   : > { %2174 = vsyncadd (%p3014_p7), %s343_s8, 4294963200  ;;  %s1621_s7 = sshll.u32 %s2549_s29, 7  ;;  %s1622_s20 = sshll.u32 %s2205_s30, 1 }
  0x90   : > { %p403_p8 = scmp.lt.s32.totalorder %s1622_s20, 3  ;;  %s2575_s17 = scalar_lea.vmem [#allocation8], %s1619_s16 }
  0x91   : > { %s2577_s5 = scalar_lea.vmem [#allocation9], %s1621_s7  ;;  %p1623_p10 = scmp.ne.s32.totalorder %s2205_s30, 0 }
  0x92   : > { %s3042_s20 = smov (!%p403_p8, %s1622_s20), 3  ;;  %v2231_v0 = vmov (!%p1623_p10), 0.0  }
  0x93   : > { %s405_s1 = scalar_lea.vmem %s2965_s2, %s3042_s20  ;;  %413 = sbr.rel (%p1623_p10) target bundleno = 155 (0x9b), region = 64  ;;  %414 = vst [vmem:[#allocation2] sm:$0xff] (!%p1623_p10), %v2231_v0  ;;  %415 = vst [vmem:[#allocation2 + $0x8] sm:$0xff] (!%p1623_p10), %v2231_v0 }
  0x94   : > { %416 = vst [vmem:[#allocation2 + $0x10] sm:$0xff] (!%p1623_p10), %v2231_v0  ;;  %417 = vst [vmem:[#allocation2 + $0x18] sm:$0xff] (!%p1623_p10), %v2231_v0 }
  0x95   : > { %418 = vst [vmem:[#allocation2 + $0x20] sm:$0xff] (!%p1623_p10), %v2231_v0  ;;  %419 = vst [vmem:[#allocation2 + $0x28] sm:$0xff] (!%p1623_p10), %v2231_v0 }
  0x96   : > { %420 = vst [vmem:[#allocation2 + $0x30] sm:$0xff] (!%p1623_p10), %v2231_v0  ;;  %421 = vst [vmem:[#allocation2 + $0x38] sm:$0xff] (!%p1623_p10), %v2231_v0 }
  0x97   : > { %422 = vst [vmem:[#allocation2 + $0x40] sm:$0xff] (!%p1623_p10), %v2231_v0  ;;  %423 = vst [vmem:[#allocation2 + $0x48] sm:$0xff] (!%p1623_p10), %v2231_v0 }
  0x98   : > { %424 = vst [vmem:[#allocation2 + $0x50] sm:$0xff] (!%p1623_p10), %v2231_v0  ;;  %425 = vst [vmem:[#allocation2 + $0x58] sm:$0xff] (!%p1623_p10), %v2231_v0 }
  0x99   : > { %426 = vst [vmem:[#allocation2 + $0x60] sm:$0xff] (!%p1623_p10), %v2231_v0  ;;  %427 = vst [vmem:[#allocation2 + $0x68] sm:$0xff] (!%p1623_p10), %v2231_v0 }
  0x9a   : > { %428 = vst [vmem:[#allocation2 + $0x70] sm:$0xff] %v2231_v0  ;;  %429 = vst [vmem:[#allocation2 + $0x78] sm:$0xff] %v2231_v0 }
  0x9b PF: > { %v1861_v1 = vld [vmem:[%s2561_s4 + $0x4] ss:$8 sps:$4 sm:$0xff]   ;;  %v1863_v2 = vld [vmem:[%s2561_s4] ss:$8 sps:$4 sm:$0xff]   ;;  %v2232_v3 = vmov 0   ;;  %v1887_v24 = vld [vmem:[%s2553_s18 + $0x10] sm:$0xff]   ;;  %v465_v42 = vlaneseq }
  0x9c   : > { %643 = vmatprep.mubr.bf16.mxu0 %v2232_v3  ;;  %611 = vmatprep.subr.bf16.mxu0 %v1861_v1  ;;  %v1864_v4 = vld [vmem:[%s2561_s4 + $0x14] ss:$8 sps:$4 sm:$0xff]   ;;  %v1866_v5 = vld [vmem:[%s2561_s4 + $0x10] ss:$8 sps:$4 sm:$0xff]   ;;  %v1867_v6 = vld [vmem:[%s2561_s4 + $0x24] ss:$8 sps:$4 sm:$0xff]  }
  0x9d   : > { %612 = vmatpush1.bf16.msra.mxu0 %v1863_v2  ;;  %v1869_v7 = vld [vmem:[%s2561_s4 + $0x20] ss:$8 sps:$4 sm:$0xff]   ;;  %v1870_v8 = vld [vmem:[%s2561_s4 + $0x34] ss:$8 sps:$4 sm:$0xff]   ;;  %v1872_v9 = vld [vmem:[%s2561_s4 + $0x30] ss:$8 sps:$4 sm:$0xff]  }
  0x9e   : > { %613 = vmatprep.subr.bf16.mxu0 %v1864_v4  ;;  %v1873_v10 = vld [vmem:[%s2561_s4 + $0x44] ss:$8 sps:$4 sm:$0xff]   ;;  %v1875_v11 = vld [vmem:[%s2561_s4 + $0x40] ss:$8 sps:$4 sm:$0xff]   ;;  %v1876_v12 = vld [vmem:[%s2561_s4 + $0x54] ss:$8 sps:$4 sm:$0xff]  }
  0x9f   : > { %v1878_v13 = vld [vmem:[%s2561_s4 + $0x50] ss:$8 sps:$4 sm:$0xff]   ;;  %v1879_v14 = vld [vmem:[%s2561_s4 + $0x64] ss:$8 sps:$4 sm:$0xff]   ;;  %v1881_v17 = vld [vmem:[%s2561_s4 + $0x60] ss:$8 sps:$4 sm:$0xff]  }
  0xa0   : > { %v1893_v15 = vld [vmem:[%s2575_s17 + $0x40] sm:$0xff]   ;;  %v1895_v18 = vld [vmem:[%s2575_s17 + $0x48] sm:$0xff]   ;;  %v1882_v19 = vld [vmem:[%s2561_s4 + $0x74] ss:$8 sps:$4 sm:$0xff]   ;;  %v466_v43 = vshrl.u32 %v465_v42, 7  ;;  %p1664_p2 = scmp.ne.s32.totalorder %s2205_s30, 1 }
  0xa1   : > { %614 = vmatpush1.bf16.msra.mxu0 %v1866_v5  ;;  %v1894_v16 = vld [vmem:[%s2575_s17] sm:$0xff]   ;;  %1676 = vmatprep.subr.bf16.mxu1 %v1893_v15  ;;  %v1896_v20 = vld [vmem:[%s2575_s17 + $0x8] sm:$0xff]   ;;  %v1884_v21 = vld [vmem:[%s2561_s4 + $0x70] ss:$8 sps:$4 sm:$0xff]   ;;  %s3015_s10 = sld [smem:[#allocation22_spill]] (!%p1664_p2)  ;;  %s3017_s16 = sld [smem:[#allocation24_spill]] (!%p1664_p2) }
  0xa2   : > { %615 = vmatprep.subr.bf16.mxu0 %v1867_v6  ;;  %1677 = vmatpush3.bf16.msra.mxu1 %v1894_v16  ;;  %v1885_v22 = vld [vmem:[%s2553_s18] sm:$0xff]   ;;  %v1886_v23 = vld [vmem:[%s2553_s18 + $0x8] sm:$0xff]   ;;  %v1888_v25 = vld [vmem:[%s2553_s18 + $0x18] sm:$0xff]   ;;  %v2625_v46 = vsub.s32 0, %v466_v43  ;;  %v471_v47 = vsub.s32 2, %v466_v43 }
  0xa3   : > { %1678 = vmatprep.subr.bf16.mxu1 %v1895_v18  ;;  %v1889_v26 = vld [vmem:[%s2553_s18 + $0x20] sm:$0xff]   ;;  %v1890_v27 = vld [vmem:[%s2553_s18 + $0x28] sm:$0xff]   ;;  %v1891_v28 = vld [vmem:[%s2553_s18 + $0x30] sm:$0xff]  }
  0xa4   : > { %v1892_v29 = vld [vmem:[%s2553_s18 + $0x38] sm:$0xff]   ;;  %v1897_v30 = vld [vmem:[%s2575_s17 + $0x50] sm:$0xff]   ;;  %v1901_v34 = vld [vmem:[%s2575_s17 + $0x60] sm:$0xff]   ;;  %s3016_s18 = sld [smem:[#allocation23_spill]] (!%p1664_p2) }
  0xa5   : > { %616 = vmatpush1.bf16.msra.mxu0 %v1869_v7  ;;  %v1898_v31 = vld [vmem:[%s2575_s17 + $0x10] sm:$0xff]   ;;  %v1899_v32 = vld [vmem:[%s2575_s17 + $0x58] sm:$0xff]   ;;  %v1902_v35 = vld [vmem:[%s2575_s17 + $0x20] sm:$0xff]  }
  0xa6   : > { %617 = vmatprep.subr.bf16.mxu0 %v1870_v8  ;;  %1679 = vmatpush3.bf16.msra.mxu1 %v1896_v20  ;;  %v1900_v33 = vld [vmem:[%s2575_s17 + $0x18] sm:$0xff]   ;;  %v1903_v36 = vld [vmem:[%s2575_s17 + $0x68] sm:$0xff]   ;;  %v1905_v38 = vld [vmem:[%s2575_s17 + $0x70] sm:$0xff]  }
  0xa7   : > { %1680 = vmatprep.subr.bf16.mxu1 %v1897_v30  ;;  %v1904_v37 = vld [vmem:[%s2575_s17 + $0x28] sm:$0xff]   ;;  %v1906_v39 = vld [vmem:[%s2575_s17 + $0x30] sm:$0xff]   ;;  %v1907_v40 = vld [vmem:[%s2575_s17 + $0x78] sm:$0xff]  }
  0xa8   : > { %v1908_v41 = vld [vmem:[%s2575_s17 + $0x38] sm:$0xff]   ;;  %v462_v44 = vld [vmem:[%s405_s1] sm:$0x3] }
  0xa9   : > { %618 = vmatpush1.bf16.msra.mxu0 %v1872_v9  ;;  %v463_v45 = vunpack.c.l.bf16 %v462_v44 }
  0xaa   : > { %619 = vmatprep.subr.bf16.mxu0 %v1873_v10  ;;  %1681 = vmatpush3.bf16.msra.mxu1 %v1898_v31 }
  0xab   : > { %1682 = vmatprep.subr.bf16.mxu1 %v1899_v32  ;;  %v468_v48 = vrot.slane %v463_v45, %v2625_v46  ;;  %v472_v49 = vrot.slane %v463_v45, %v471_v47 }
  0xad   : > { %620 = vmatpush1.bf16.msra.mxu0 %v1875_v11  ;;  %v2629_v50 = vrot.slane %v468_v48, %v2625_v46  ;;  %v2632_v51 = vrot.slane %v472_v49, %v2625_v46 }
  0xae   : > { %621 = vmatprep.subr.bf16.mxu0 %v1876_v12  ;;  %1683 = vmatpush3.bf16.msra.mxu1 %v1900_v33 }
  0xaf   : > { %1684 = vmatprep.subr.bf16.mxu1 %v1901_v34 }
  0xb1   : > { %622 = vmatpush1.bf16.msra.mxu0 %v1878_v13 }
  0xb2   : > { %623 = vmatprep.subr.bf16.mxu0 %v1879_v14  ;;  %1685 = vmatpush3.bf16.msra.mxu1 %v1902_v35 }
  0xb3   : > { %1686 = vmatprep.subr.bf16.mxu1 %v1903_v36 }
  0xb5   : > { %624 = vmatpush1.bf16.msra.mxu0 %v1881_v17 }
  0xb6   : > { %625 = vmatprep.subr.bf16.mxu0 %v1882_v19  ;;  %1687 = vmatpush3.bf16.msra.mxu1 %v1904_v37 }
  0xb7   : > { %1688 = vmatprep.subr.bf16.mxu1 %v1905_v38 }
  0xb9   : > { %626 = vmatpush1.bf16.msra.mxu0 %v1884_v21 }
  0xba   : > { %1689 = vmatpush3.bf16.msra.mxu1 %v1906_v39 }
  0xbb   : > { %1690 = vmatprep.subr.bf16.mxu1 %v1907_v40 }
  0xbc   : > { %644 = vmatmul.mubr.bf16.vlgmr.msra.gmra.mrb[0].mxu0 %v1885_v22 }
  0xbd   : > { %653 = vmatprep.mubr.bf16.mxu0 %v2232_v3 }
  0xbe   : > { %1691 = vmatpush3.bf16.msra.mxu1 %v1908_v41 }
  0xc4   : > { %654 = vmatmul.mubr.bf16.gmra.mrb[4].mxu0 %v1886_v23 }
  0xc5   : > { %663 = vmatprep.mubr.bf16.mxu0 %v2232_v3 }
  0xcc   : > { %664 = vmatmul.mubr.bf16.gmra.mrb[8].mxu0 %v1887_v24 }
  0xcd   : > { %673 = vmatprep.mubr.bf16.mxu0 %v2232_v3 }
  0xd4   : > { %674 = vmatmul.mubr.bf16.gmra.mrb[12].mxu0 %v1888_v25 }
  0xd5   : > { %683 = vmatprep.mubr.bf16.mxu0 %v2232_v3 }
  0xdc   : > { %684 = vmatmul.mubr.bf16.gmra.mrb[16].mxu0 %v1889_v26 }
  0xdd   : > { %693 = vmatprep.mubr.bf16.mxu0 %v2232_v3 }
  0xe4   : > { %694 = vmatmul.mubr.bf16.gmra.mrb[20].mxu0 %v1890_v27 }
  0xe5   : > { %703 = vmatprep.mubr.bf16.mxu0 %v2232_v3 }
  0xec   : > { %704 = vmatmul.mubr.bf16.gmra.mrb[24].mxu0 %v1891_v28 }
  0xed   : > { %713 = vmatprep.mubr.bf16.mxu0 %v2232_v3 }
  0xf4   : > { %714 = vmatmul.mubr.bf16.gmra.mrb[28].mxu0 %v1892_v29 }
 0x18f   : > { %v645_v52 = vpop.f32.mrb[0].mxu0 }
 0x190   : > { %v646_v53 = vadd.f32 %v645_v52, %v2629_v50  ;;  %v647_v54 = vpop.f32.mrb[1].mxu0 }
 0x191   : > { %v648_v55 = vadd.f32 %v647_v54, %v2632_v51  ;;  %v649_v56 = vpop.f32.mrb[2].mxu0 }
 0x192   : > { %v756_v57 = vmul.f32 0.70710677, %v646_v53  ;;  %v650_v58 = vadd.f32 %v649_v56, %v2629_v50  ;;  %v651_v59 = vpop.f32.mrb[3].mxu0  ;;  %v724_v16 = vmul.f32 0.5, %v646_v53 }
 0x193   : > { %v757_v60 = vmul.f32 0.70710677, %v648_v55  ;;  %v652_v61 = vadd.f32 %v651_v59, %v2632_v51  ;;  %v725_v26 = vmul.f32 0.5, %v648_v55 }
 0x194   : > { %1909 = verf.f32 %v756_v57  ;;  %v758_v62 = vmul.f32 0.70710677, %v650_v58  ;;  %v726_v21 = vmul.f32 0.5, %v650_v58 }
 0x195   : > { %1911 = verf.f32 %v757_v60  ;;  %v759_v63 = vmul.f32 0.70710677, %v652_v61  ;;  %v727_v32 = vmul.f32 0.5, %v652_v61 }
 0x196   : > { %1913 = verf.f32 %v758_v62 }
 0x197   : > { %1915 = verf.f32 %v759_v63  ;;  %v655_v0 = vpop.f32.mrb[4].mxu0 }
 0x198   : > { %v656_v1 = vadd.f32 %v655_v0, %v2629_v50  ;;  %v657_v2 = vpop.f32.mrb[5].mxu0 }
 0x199   : > { %v658_v3 = vadd.f32 %v657_v2, %v2632_v51  ;;  %v659_v4 = vpop.f32.mrb[6].mxu0 }
 0x19a   : > { %v760_v5 = vmul.f32 0.70710677, %v656_v1  ;;  %v660_v6 = vadd.f32 %v659_v4, %v2629_v50  ;;  %v661_v7 = vpop.f32.mrb[7].mxu0  ;;  %v728_v54 = vmul.f32 0.5, %v656_v1 }
 0x19b   : > { %v761_v8 = vmul.f32 0.70710677, %v658_v3  ;;  %v662_v9 = vadd.f32 %v661_v7, %v2632_v51  ;;  %v729_v59 = vmul.f32 0.5, %v658_v3 }
 0x19c   : > { %1917 = verf.f32 %v760_v5  ;;  %v762_v10 = vmul.f32 0.70710677, %v660_v6  ;;  %v730_v55 = vmul.f32 0.5, %v660_v6 }
 0x19d   : > { %1919 = verf.f32 %v761_v8  ;;  %v763_v11 = vmul.f32 0.70710677, %v662_v9  ;;  %v731_v60 = vmul.f32 0.5, %v662_v9 }
 0x19e   : > { %v1910_v12 = vpop.eup %1909  ;;  %1921 = verf.f32 %v762_v10 }
 0x19f   : > { %v1912_v13 = vpop.eup %1911  ;;  %1923 = verf.f32 %v763_v11  ;;  %v665_v14 = vpop.f32.mrb[8].mxu0  ;;  %v820_v17 = vadd.f32 1.0, %v1910_v12 }
 0x1a0   : > { %v1914_v15 = vpop.eup %1913  ;;  %v2643_v18 = vadd.f32 %v665_v14, %v2629_v50  ;;  %v667_v19 = vpop.f32.mrb[9].mxu0  ;;  %v821_v25 = vadd.f32 1.0, %v1912_v13 }
 0x1a1   : > { %v1916_v20 = vpop.eup %1915  ;;  %v822_v22 = vadd.f32 1.0, %v1914_v15  ;;  %v2646_v23 = vadd.f32 %v667_v19, %v2632_v51  ;;  %v669_v24 = vpop.f32.mrb[10].mxu0  ;;  %v852_v35 = vmul.f32 %v820_v17, %v724_v16 }
 0x1a2   : > { %v764_v27 = vmul.f32 0.70710677, %v2643_v18  ;;  %v2650_v28 = vadd.f32 %v669_v24, %v2629_v50  ;;  %v671_v29 = vpop.f32.mrb[11].mxu0  ;;  %v823_v30 = vadd.f32 1.0, %v1916_v20  ;;  %v853_v38 = vmul.f32 %v821_v25, %v725_v26 }
 0x1a3   : > { %v854_v31 = vmul.f32 %v822_v22, %v726_v21  ;;  %v765_v33 = vmul.f32 0.70710677, %v2646_v23  ;;  %v2654_v34 = vadd.f32 %v671_v29, %v2632_v51  ;;  %v732_v21 = vmul.f32 0.5, %v2643_v18 }
 0x1a4   : > { %1925 = verf.f32 %v764_v27  ;;  %v766_v36 = vmul.f32 0.70710677, %v2650_v28  ;;  %v855_v39 = vmul.f32 %v823_v30, %v727_v32  ;;  %v734_v22 = vmul.f32 0.5, %v2650_v28 }
 0x1a5   : > { %1927 = verf.f32 %v765_v33  ;;  %v767_v37 = vmul.f32 0.70710677, %v2654_v34  ;;  %v900_v41 = vpack.c.bf16 %v854_v31, %v852_v35  ;;  %v733_v27 = vmul.f32 0.5, %v2646_v23 }
 0x1a6   : > { %v1918_v40 = vpop.eup %1917  ;;  %1929 = verf.f32 %v766_v36  ;;  %v901_v45 = vpack.c.bf16 %v855_v39, %v853_v38  ;;  %v735_v29 = vmul.f32 0.5, %v2654_v34 }
 0x1a7   : > { %v1920_v42 = vpop.eup %1919  ;;  %v824_v43 = vadd.f32 1.0, %v1918_v40  ;;  %1931 = verf.f32 %v767_v37  ;;  %v675_v44 = vpop.f32.mrb[12].mxu0 }
 0x1a8   : > { %v1922_v47 = vpop.eup %1921  ;;  %v825_v48 = vadd.f32 1.0, %v1920_v42  ;;  %v2659_v49 = vadd.f32 %v675_v44, %v2629_v50  ;;  %v677_v52 = vpop.f32.mrb[13].mxu0  ;;  %1076 = vmatprep.mubr.bf16.mxu1 %v901_v45 }
 0x1a9   : > { %v1924_v53 = vpop.eup %1923  ;;  %v826_v56 = vadd.f32 1.0, %v1922_v47  ;;  %v2662_v57 = vadd.f32 %v677_v52, %v2632_v51  ;;  %v679_v58 = vpop.f32.mrb[14].mxu0  ;;  %1077 = vmatmul.mubr.bf16.vlgmr.msra.gmra.mrb[0].mxu1 %v900_v41  ;;  %v856_v0 = vmul.f32 %v824_v43, %v728_v54 }
 0x1aa   : > { %v827_v61 = vadd.f32 1.0, %v1924_v53  ;;  %v768_v62 = vmul.f32 0.70710677, %v2659_v49  ;;  %v681_v63 = vpop.f32.mrb[15].mxu0  ;;  %v680_v1 = vadd.f32 %v679_v58, %v2629_v50  ;;  %v857_v5 = vmul.f32 %v825_v48, %v729_v59 }
 0x1ab   : > { %v858_v2 = vmul.f32 %v826_v56, %v730_v55  ;;  %v769_v4 = vmul.f32 0.70710677, %v2662_v57  ;;  %v682_v7 = vadd.f32 %v681_v63, %v2632_v51  ;;  %v736_v52 = vmul.f32 0.5, %v2659_v49 }
 0x1ac   : > { %v859_v6 = vmul.f32 %v827_v61, %v731_v60  ;;  %1933 = verf.f32 %v768_v62  ;;  %v770_v8 = vmul.f32 0.70710677, %v680_v1  ;;  %v737_v58 = vmul.f32 0.5, %v2662_v57 }
 0x1ad   : > { %1935 = verf.f32 %v769_v4  ;;  %v902_v3 = vpack.c.bf16 %v858_v2, %v856_v0  ;;  %v771_v10 = vmul.f32 0.70710677, %v682_v7  ;;  %v738_v59 = vmul.f32 0.5, %v680_v1 }
 0x1ae   : > { %v1926_v9 = vpop.eup %1925  ;;  %v903_v11 = vpack.c.bf16 %v859_v6, %v857_v5  ;;  %1937 = verf.f32 %v770_v8  ;;  %v739_v63 = vmul.f32 0.5, %v682_v7 }
 0x1af   : > { %v1928_v12 = vpop.eup %1927  ;;  %v828_v13 = vadd.f32 1.0, %v1926_v9  ;;  %v685_v14 = vpop.f32.mrb[16].mxu0  ;;  %1939 = verf.f32 %v771_v10 }
 0x1b0   : > { %v1930_v15 = vpop.eup %1929  ;;  %v829_v16 = vadd.f32 1.0, %v1928_v12  ;;  %v2669_v17 = vadd.f32 %v685_v14, %v2629_v50  ;;  %v687_v19 = vpop.f32.mrb[17].mxu0  ;;  %1084 = vmatprep.mubr.bf16.mxu1 %v903_v11 }
 0x1b1   : > { %v1932_v20 = vpop.eup %1931  ;;  %v830_v24 = vadd.f32 1.0, %v1930_v15  ;;  %v2674_v25 = vadd.f32 %v687_v19, %v2632_v51  ;;  %v689_v26 = vpop.f32.mrb[18].mxu0  ;;  %1085 = vmatmul.mubr.bf16.gmra.mrb[4].mxu1 %v902_v3  ;;  %v860_v33 = vmul.f32 %v828_v13, %v732_v21 }
 0x1b2   : > { %v831_v30 = vadd.f32 1.0, %v1932_v20  ;;  %v772_v31 = vmul.f32 0.70710677, %v2669_v17  ;;  %v691_v32 = vpop.f32.mrb[19].mxu0  ;;  %v690_v28 = vadd.f32 %v689_v26, %v2629_v50  ;;  %v861_v36 = vmul.f32 %v829_v16, %v733_v27 }
 0x1b3   : > { %v862_v35 = vmul.f32 %v830_v24, %v734_v22  ;;  %v773_v18 = vmul.f32 0.70710677, %v2674_v25  ;;  %v692_v38 = vadd.f32 %v691_v32, %v2632_v51  ;;  %v740_v19 = vmul.f32 0.5, %v2669_v17 }
 0x1b4   : > { %v863_v37 = vmul.f32 %v831_v30, %v735_v29  ;;  %1941 = verf.f32 %v772_v31  ;;  %v774_v23 = vmul.f32 0.70710677, %v690_v28  ;;  %v741_v26 = vmul.f32 0.5, %v2674_v25 }
 0x1b5   : > { %1943 = verf.f32 %v773_v18  ;;  %v904_v39 = vpack.c.bf16 %v862_v35, %v860_v33  ;;  %v775_v40 = vmul.f32 0.70710677, %v692_v38  ;;  %v742_v27 = vmul.f32 0.5, %v690_v28 }
 0x1b6   : > { %v1934_v34 = vpop.eup %1933  ;;  %v905_v41 = vpack.c.bf16 %v863_v37, %v861_v36  ;;  %1945 = verf.f32 %v774_v23  ;;  %v743_v32 = vmul.f32 0.5, %v692_v38 }
 0x1b7   : > { %v1936_v42 = vpop.eup %1935  ;;  %v695_v43 = vpop.f32.mrb[20].mxu0  ;;  %v832_v44 = vadd.f32 1.0, %v1934_v34  ;;  %1947 = verf.f32 %v775_v40 }
 0x1b8   : > { %v2683_v45 = vadd.f32 %v695_v43, %v2629_v50  ;;  %v697_v47 = vpop.f32.mrb[21].mxu0  ;;  %1092 = vmatprep.mubr.bf16.mxu1 %v905_v41  ;;  %v1938_v48 = vpop.eup %1937  ;;  %v833_v53 = vadd.f32 1.0, %v1936_v42 }
 0x1b9   : > { %v2687_v54 = vadd.f32 %v697_v47, %v2632_v51  ;;  %v699_v55 = vpop.f32.mrb[22].mxu0  ;;  %v1940_v56 = vpop.eup %1939  ;;  %v834_v60 = vadd.f32 1.0, %v1938_v48  ;;  %1093 = vmatmul.mubr.bf16.gmra.mrb[8].mxu1 %v904_v39  ;;  %v864_v4 = vmul.f32 %v832_v44, %v736_v52 }
 0x1ba   : > { %v776_v61 = vmul.f32 0.70710677, %v2683_v45  ;;  %v701_v62 = vpop.f32.mrb[23].mxu0  ;;  %v835_v0 = vadd.f32 1.0, %v1940_v56  ;;  %v2693_v49 = vadd.f32 %v699_v55, %v2629_v50  ;;  %v865_v57 = vmul.f32 %v833_v53, %v737_v58 }
 0x1bb   : > { %v777_v2 = vmul.f32 0.70710677, %v2687_v54  ;;  %v866_v5 = vmul.f32 %v834_v60, %v738_v59  ;;  %v2696_v6 = vadd.f32 %v701_v62, %v2632_v51  ;;  %v744_v52 = vmul.f32 0.5, %v2683_v45 }
 0x1bc   : > { %1949 = verf.f32 %v776_v61  ;;  %v867_v1 = vmul.f32 %v835_v0, %v739_v63  ;;  %v778_v8 = vmul.f32 0.70710677, %v2693_v49  ;;  %v745_v59 = vmul.f32 0.5, %v2687_v54 }
 0x1bd   : > { %1951 = verf.f32 %v777_v2  ;;  %v779_v7 = vmul.f32 0.70710677, %v2696_v6  ;;  %v906_v9 = vpack.c.bf16 %v866_v5, %v864_v4  ;;  %v746_v60 = vmul.f32 0.5, %v2693_v49 }
 0x1be   : > { %v1942_v3 = vpop.eup %1941  ;;  %1953 = verf.f32 %v778_v8  ;;  %v907_v12 = vpack.c.bf16 %v867_v1, %v865_v57  ;;  %v747_v0 = vmul.f32 0.5, %v2696_v6 }
 0x1bf   : > { %v1944_v10 = vpop.eup %1943  ;;  %v705_v11 = vpop.f32.mrb[24].mxu0  ;;  %v836_v13 = vadd.f32 1.0, %v1942_v3  ;;  %1955 = verf.f32 %v779_v7 }
 0x1c0   : > { %v2701_v14 = vadd.f32 %v705_v11, %v2629_v50  ;;  %v707_v15 = vpop.f32.mrb[25].mxu0  ;;  %v1946_v16 = vpop.eup %1945  ;;  %v837_v20 = vadd.f32 1.0, %v1944_v10  ;;  %1100 = vmatprep.mubr.bf16.mxu1 %v907_v12 }
 0x1c1   : > { %v2705_v21 = vadd.f32 %v707_v15, %v2632_v51  ;;  %v709_v22 = vpop.f32.mrb[26].mxu0  ;;  %v1948_v24 = vpop.eup %1947  ;;  %v838_v29 = vadd.f32 1.0, %v1946_v16  ;;  %1101 = vmatmul.mubr.bf16.gmra.mrb[12].mxu1 %v906_v9  ;;  %v868_v18 = vmul.f32 %v836_v13, %v740_v19 }
 0x1c2   : > { %v780_v30 = vmul.f32 0.70710677, %v2701_v14  ;;  %v711_v31 = vpop.f32.mrb[27].mxu0  ;;  %v839_v33 = vadd.f32 1.0, %v1948_v24  ;;  %v710_v17 = vadd.f32 %v709_v22, %v2629_v50  ;;  %v869_v23 = vmul.f32 %v837_v20, %v741_v26 }
 0x1c3   : > { %v781_v35 = vmul.f32 0.70710677, %v2705_v21  ;;  %v870_v36 = vmul.f32 %v838_v29, %v742_v27  ;;  %v712_v37 = vadd.f32 %v711_v31, %v2632_v51  ;;  %v748_v15 = vmul.f32 0.5, %v2701_v14 }
 0x1c4   : > { %1957 = verf.f32 %v780_v30  ;;  %v871_v39 = vmul.f32 %v839_v33, %v743_v32  ;;  %v782_v25 = vmul.f32 0.70710677, %v710_v17  ;;  %v750_v16 = vmul.f32 0.5, %v710_v17 }
 0x1c5   : > { %1959 = verf.f32 %v781_v35  ;;  %v783_v34 = vmul.f32 0.70710677, %v712_v37  ;;  %v908_v40 = vpack.c.bf16 %v870_v36, %v868_v18  ;;  %v749_v19 = vmul.f32 0.5, %v2705_v21 }
 0x1c6   : > { %v1950_v28 = vpop.eup %1949  ;;  %1961 = verf.f32 %v782_v25  ;;  %v909_v42 = vpack.c.bf16 %v871_v39, %v869_v23  ;;  %v751_v20 = vmul.f32 0.5, %v712_v37 }
 0x1c7   : > { %v1952_v41 = vpop.eup %1951  ;;  %v715_v38 = vpop.f32.mrb[28].mxu0  ;;  %v840_v43 = vadd.f32 1.0, %v1950_v28  ;;  %1963 = verf.f32 %v783_v34 }
 0x1c8   : > { %v716_v44 = vadd.f32 %v715_v38, %v2629_v50  ;;  %v717_v47 = vpop.f32.mrb[29].mxu0  ;;  %v1954_v48 = vpop.eup %1953  ;;  %v841_v53 = vadd.f32 1.0, %v1952_v41  ;;  %1108 = vmatprep.mubr.bf16.mxu1 %v909_v42 }
 0x1c9   : > { %v718_v55 = vadd.f32 %v717_v47, %v2632_v51  ;;  %v719_v56 = vpop.f32.mrb[30].mxu0  ;;  %v1956_v58 = vpop.eup %1955  ;;  %v842_v61 = vadd.f32 1.0, %v1954_v48  ;;  %1109 = vmatmul.mubr.bf16.gmra.mrb[16].mxu1 %v908_v40  ;;  %v872_v5 = vmul.f32 %v840_v43, %v744_v52  ;;  %v884_v47 = vld [vmem:[#allocation2] sm:$0xff] }
 0x1ca   : > { %v784_v62 = vmul.f32 0.70710677, %v716_v44  ;;  %v721_v63 = vpop.f32.mrb[31].mxu0  ;;  %v843_v2 = vadd.f32 1.0, %v1956_v58  ;;  %v720_v45 = vadd.f32 %v719_v56, %v2629_v50  ;;  %v873_v8 = vmul.f32 %v841_v53, %v745_v59 }
 0x1cb   : > { %v785_v4 = vmul.f32 0.70710677, %v718_v55  ;;  %v874_v57 = vmul.f32 %v842_v61, %v746_v60  ;;  %v722_v1 = vadd.f32 %v721_v63, %v2632_v51  ;;  %v752_v17 = vmul.f32 0.5, %v716_v44  ;;  %v885_v44 = vld [vmem:[#allocation2 + $0x8] sm:$0xff]  ;;  %v886_v61 = vld [vmem:[#allocation2 + $0x10] sm:$0xff] }
 0x1cc   : > { %1965 = verf.f32 %v784_v62  ;;  %v875_v3 = vmul.f32 %v843_v2, %v747_v0  ;;  %v786_v54 = vmul.f32 0.70710677, %v720_v45  ;;  %v754_v23 = vmul.f32 0.5, %v720_v45  ;;  %v887_v2 = vld [vmem:[#allocation2 + $0x18] sm:$0xff] }
 0x1cd   : > { %1967 = verf.f32 %v785_v4  ;;  %v787_v7 = vmul.f32 0.70710677, %v722_v1  ;;  %v910_v9 = vpack.c.bf16 %v874_v57, %v872_v5  ;;  %v753_v21 = vmul.f32 0.5, %v718_v55 }
 0x1ce   : > { %v1958_v49 = vpop.eup %1957  ;;  %1969 = verf.f32 %v786_v54  ;;  %v911_v11 = vpack.c.bf16 %v875_v3, %v873_v8  ;;  %v755_v37 = vmul.f32 0.5, %v722_v1  ;;  %v888_v8 = vld [vmem:[#allocation2 + $0x20] sm:$0xff] }
 0x1cf   : > { %v1960_v10 = vpop.eup %1959  ;;  %v844_v6 = vadd.f32 1.0, %v1958_v49  ;;  %1971 = verf.f32 %v787_v7  ;;  %v889_v7 = vld [vmem:[#allocation2 + $0x28] sm:$0xff] }
 0x1d0   : > { %v1962_v12 = vpop.eup %1961  ;;  %v845_v13 = vadd.f32 1.0, %v1960_v10  ;;  %1116 = vmatprep.mubr.bf16.mxu1 %v911_v11 }
 0x1d1   : > { %v1964_v50 = vpop.eup %1963  ;;  %v846_v51 = vadd.f32 1.0, %v1962_v12  ;;  %1117 = vmatmul.mubr.bf16.gmra.mrb[20].mxu1 %v910_v9  ;;  %v876_v24 = vmul.f32 %v844_v6, %v748_v15 }
 0x1d2   : > { %v847_v22 = vadd.f32 1.0, %v1964_v50  ;;  %v877_v27 = vmul.f32 %v845_v13, %v749_v19  ;;  %v890_v13 = vld [vmem:[#allocation2 + $0x30] sm:$0xff] }
 0x1d3   : > { %v878_v26 = vmul.f32 %v846_v51, %v750_v16  ;;  %v891_v51 = vld [vmem:[#allocation2 + $0x38] sm:$0xff] }
 0x1d4   : > { %v879_v29 = vmul.f32 %v847_v22, %v751_v20 }
 0x1d5   : > { %v912_v31 = vpack.c.bf16 %v878_v26, %v876_v24 }
 0x1d6   : > { %v1966_v30 = vpop.eup %1965  ;;  %v913_v33 = vpack.c.bf16 %v879_v29, %v877_v27  ;;  %v892_v27 = vld [vmem:[#allocation2 + $0x40] sm:$0xff] }
 0x1d7   : > { %v1968_v32 = vpop.eup %1967  ;;  %v848_v35 = vadd.f32 1.0, %v1966_v30 }
 0x1d8   : > { %v1970_v18 = vpop.eup %1969  ;;  %v849_v36 = vadd.f32 1.0, %v1968_v32  ;;  %1124 = vmatprep.mubr.bf16.mxu1 %v913_v33  ;;  %v893_v32 = vld [vmem:[#allocation2 + $0x48] sm:$0xff] }
 0x1d9   : > { %v1972_v14 = vpop.eup %1971  ;;  %v850_v39 = vadd.f32 1.0, %v1970_v18  ;;  %1125 = vmatmul.mubr.bf16.gmra.mrb[24].mxu1 %v912_v31  ;;  %v880_v28 = vmul.f32 %v848_v35, %v752_v17  ;;  %v894_v17 = vld [vmem:[#allocation2 + $0x50] sm:$0xff] }
 0x1da   : > { %v851_v25 = vadd.f32 1.0, %v1972_v14  ;;  %v881_v40 = vmul.f32 %v849_v36, %v753_v21 }
 0x1db   : > { %v882_v34 = vmul.f32 %v850_v39, %v754_v23 }
 0x1dc   : > { %v883_v41 = vmul.f32 %v851_v25, %v755_v37  ;;  %v895_v37 = vld [vmem:[#allocation2 + $0x58] sm:$0xff] }
 0x1dd   : > { %v914_v38 = vpack.c.bf16 %v882_v34, %v880_v28 }
 0x1de   : > { %v915_v42 = vpack.c.bf16 %v883_v41, %v881_v40 }
 0x1e0   : > { %1132 = vmatprep.mubr.bf16.mxu1 %v915_v42 }
 0x1e1   : > { %1133 = vmatmul.mubr.bf16.gmra.mrb[28].mxu1 %v914_v38  ;;  %v896_v38 = vld [vmem:[#allocation2 + $0x60] sm:$0xff] }
 0x27c   : > { %v1692_v43 = vpop.f32.mrb[0].mxu1 }
 0x27d   : > { %v1693_v48 = vpop.f32.mrb[1].mxu1 }
 0x27e   : > { %v1694_v52 = vadd.f32 %v1693_v48, %v1692_v43  ;;  %v1695_v53 = vpop.f32.mrb[2].mxu1  ;;  %v897_v48 = vld [vmem:[#allocation2 + $0x68] sm:$0xff] }
 0x27f   : > { %v1696_v56 = vpop.f32.mrb[3].mxu1 }
 0x280   : > { %v1141_v58 = vadd.f32 %v1694_v52, %v884_v47  ;;  %v1697_v59 = vadd.f32 %v1696_v56, %v1695_v53 }
 0x282   : > { %1157 = vst [vmem:[#allocation2] sm:$0xff] %v1141_v58  ;;  %v1142_v55 = vadd.f32 %v1697_v59, %v885_v44  ;;  %v898_v59 = vld [vmem:[#allocation2 + $0x70] sm:$0xff] }
 0x284   : > { %1158 = vst [vmem:[#allocation2 + $0x8] sm:$0xff] %v1142_v55  ;;  %v1698_v60 = vpop.f32.mrb[4].mxu1 }
 0x285   : > { %v1699_v62 = vpop.f32.mrb[5].mxu1 }
 0x286   : > { %v1700_v63 = vadd.f32 %v1699_v62, %v1698_v60  ;;  %v1701_v0 = vpop.f32.mrb[6].mxu1  ;;  %v899_v62 = vld [vmem:[#allocation2 + $0x78] sm:$0xff] }
 0x287   : > { %v1702_v4 = vpop.f32.mrb[7].mxu1 }
 0x288   : > { %v1143_v45 = vadd.f32 %v1700_v63, %v886_v61  ;;  %v1703_v5 = vadd.f32 %v1702_v4, %v1701_v0 }
 0x28a   : > { %1159 = vst [vmem:[#allocation2 + $0x10] sm:$0xff] %v1143_v45  ;;  %v1144_v57 = vadd.f32 %v1703_v5, %v887_v2  ;;  %v1193_v45 = vld [vmem:[%s3015_s10] sm:$0x1] (!%p1664_p2) }
 0x28b   : > { %v1194_v5 = vunpack.c.l.bf16 (!%p1664_p2), %v1193_v45 }
 0x28c   : > { %1160 = vst [vmem:[#allocation2 + $0x18] sm:$0xff] %v1144_v57  ;;  %v1704_v1 = vpop.f32.mrb[8].mxu1  ;;  %v1177_v57 = vld [vmem:[#allocation2] sm:$0xff] (!%p1664_p2) }
 0x28d   : > { %v1705_v3 = vpop.f32.mrb[9].mxu1 }
 0x28e   : > { %v1706_v54 = vadd.f32 %v1705_v3, %v1704_v1  ;;  %v1707_v49 = vpop.f32.mrb[10].mxu1  ;;  %v1178_v3 = vld [vmem:[#allocation2 + $0x8] sm:$0xff] (!%p1664_p2) }
 0x28f   : > { %v1708_v9 = vpop.f32.mrb[11].mxu1 }
 0x290   : > { %v1145_v10 = vadd.f32 %v1706_v54, %v888_v8  ;;  %v1709_v11 = vadd.f32 %v1708_v9, %v1707_v49  ;;  %v1198_v8 = vrot.slane (!%p1664_p2), %v1194_v5, %v2625_v46 }
 0x291   : > { %v1179_v1 = vld [vmem:[#allocation2 + $0x10] sm:$0xff] (!%p1664_p2) }
 0x292   : > { %1161 = vst [vmem:[#allocation2 + $0x20] sm:$0xff] %v1145_v10  ;;  %v1146_v6 = vadd.f32 %v1709_v11, %v889_v7  ;;  %v1199_v49 = vadd.f32 (!%p1664_p2), %v1198_v8, %v1177_v57  ;;  %v1201_v7 = vadd.f32 (!%p1664_p2), %v1198_v8, %v1179_v1  ;;  %v1200_v9 = vadd.f32 (!%p1664_p2), %v1198_v8, %v1178_v3 }
 0x293   : > { %v1180_v54 = vld [vmem:[#allocation2 + $0x18] sm:$0xff] (!%p1664_p2) }
 0x294   : > { %1162 = vst [vmem:[#allocation2 + $0x28] sm:$0xff] %v1146_v6  ;;  %v1710_v12 = vpop.f32.mrb[12].mxu1  ;;  %1215 = vadd.xlane.f32.xlu0 (!%p1664_p2), %v1199_v49  ;;  %1219 = vadd.xlane.f32.xlu1 (!%p1664_p2), %v1201_v7  ;;  %v1202_v10 = vadd.f32 (!%p1664_p2), %v1198_v8, %v1180_v54 }
 0x295   : > { %v1711_v50 = vpop.f32.mrb[13].mxu1 }
 0x296   : > { %v1712_v15 = vadd.f32 %v1711_v50, %v1710_v12  ;;  %v1713_v16 = vpop.f32.mrb[14].mxu1 }
 0x297   : > { %v1714_v19 = vpop.f32.mrb[15].mxu1 }
 0x298   : > { %v1147_v20 = vadd.f32 %v1712_v15, %v890_v13  ;;  %v1715_v22 = vadd.f32 %v1714_v19, %v1713_v16  ;;  %1217 = vadd.xlane.f32.xlu0 (!%p1664_p2), %v1200_v9  ;;  %1221 = vadd.xlane.f32.xlu1 (!%p1664_p2), %v1202_v10 }
 0x299   : > { %v1181_v11 = vld [vmem:[#allocation2 + $0x20] sm:$0xff] (!%p1664_p2) }
 0x29a   : > { %1163 = vst [vmem:[#allocation2 + $0x30] sm:$0xff] %v1147_v20  ;;  %v1148_v24 = vadd.f32 %v1715_v22, %v891_v51  ;;  %v1203_v12 = vadd.f32 (!%p1664_p2), %v1198_v8, %v1181_v11 }
 0x29b   : > { %v1182_v6 = vld [vmem:[#allocation2 + $0x28] sm:$0xff] (!%p1664_p2) }
 0x29c   : > { %1164 = vst [vmem:[#allocation2 + $0x38] sm:$0xff] %v1148_v24  ;;  %v1716_v26 = vpop.f32.mrb[16].mxu1  ;;  %v1204_v13 = vadd.f32 (!%p1664_p2), %v1198_v8, %v1182_v6  ;;  %1223 = vadd.xlane.f32.xlu0 (!%p1664_p2), %v1203_v12 }
 0x29d   : > { %v1717_v29 = vpop.f32.mrb[17].mxu1 }
 0x29e   : > { %v1718_v30 = vadd.f32 %v1717_v29, %v1716_v26  ;;  %v1719_v31 = vpop.f32.mrb[18].mxu1  ;;  %1225 = vadd.xlane.f32.xlu1 (!%p1664_p2), %v1204_v13 }
 0x29f   : > { %v1720_v33 = vpop.f32.mrb[19].mxu1 }
 0x2a0   : > { %v1149_v35 = vadd.f32 %v1718_v30, %v892_v27  ;;  %v1721_v18 = vadd.f32 %v1720_v33, %v1719_v31 }
 0x2a1   : > { %v1183_v50 = vld [vmem:[#allocation2 + $0x30] sm:$0xff] (!%p1664_p2) }
 0x2a2   : > { %1165 = vst [vmem:[#allocation2 + $0x40] sm:$0xff] %v1149_v35  ;;  %v1150_v36 = vadd.f32 %v1721_v18, %v893_v32  ;;  %v1205_v16 = vadd.f32 (!%p1664_p2), %v1198_v8, %v1183_v50 }
 0x2a3   : > { %v1184_v15 = vld [vmem:[#allocation2 + $0x38] sm:$0xff] (!%p1664_p2) }
 0x2a4   : > { %1166 = vst [vmem:[#allocation2 + $0x48] sm:$0xff] %v1150_v36  ;;  %v1722_v14 = vpop.f32.mrb[20].mxu1  ;;  %v1206_v46 = vadd.f32 (!%p1664_p2), %v1198_v8, %v1184_v15  ;;  %1227 = vadd.xlane.f32.xlu0 (!%p1664_p2), %v1205_v16 }
 0x2a5   : > { %v1723_v23 = vpop.f32.mrb[21].mxu1 }
 0x2a6   : > { %v1724_v39 = vadd.f32 %v1723_v23, %v1722_v14  ;;  %v1725_v21 = vpop.f32.mrb[22].mxu1  ;;  %1229 = vadd.xlane.f32.xlu1 (!%p1664_p2), %v1206_v46 }
 0x2a7   : > { %v1726_v25 = vpop.f32.mrb[23].mxu1 }
 0x2a8   : > { %v1151_v28 = vadd.f32 %v1724_v39, %v894_v17  ;;  %v1727_v34 = vadd.f32 %v1726_v25, %v1725_v21 }
 0x2a9   : > { %v1185_v51 = vld [vmem:[#allocation2 + $0x40] sm:$0xff] (!%p1664_p2) }
 0x2aa   : > { %1167 = vst [vmem:[#allocation2 + $0x50] sm:$0xff] %v1151_v28  ;;  %v1152_v40 = vadd.f32 %v1727_v34, %v895_v37  ;;  %v1207_v20 = vadd.f32 (!%p1664_p2), %v1198_v8, %v1185_v51 }
 0x2ab   : > { %v1186_v19 = vld [vmem:[#allocation2 + $0x48] sm:$0xff] (!%p1664_p2) }
 0x2ac   : > { %1168 = vst [vmem:[#allocation2 + $0x58] sm:$0xff] %v1152_v40  ;;  %v1728_v41 = vpop.f32.mrb[24].mxu1  ;;  %v2727_v22 = vadd.f32 (!%p1664_p2), %v1198_v8, %v1186_v19  ;;  %1231 = vadd.xlane.f32.xlu0 (!%p1664_p2), %v1207_v20 }
 0x2ad   : > { %v1729_v42 = vpop.f32.mrb[25].mxu1 }
 0x2ae   : > { %v1730_v43 = vadd.f32 %v1729_v42, %v1728_v41  ;;  %v1731_v47 = vpop.f32.mrb[26].mxu1  ;;  %1233 = vadd.xlane.f32.xlu1 (!%p1664_p2), %v2727_v22 }
 0x2af   : > { %v1732_v52 = vpop.f32.mrb[27].mxu1 }
 0x2b0   : > { %v1153_v53 = vadd.f32 %v1730_v43, %v896_v38  ;;  %v1733_v44 = vadd.f32 %v1732_v52, %v1731_v47 }
 0x2b1   : > { %v1187_v24 = vld [vmem:[#allocation2 + $0x50] sm:$0xff] (!%p1664_p2) }
 0x2b2   : > { %1169 = vst [vmem:[#allocation2 + $0x60] sm:$0xff] %v1153_v53  ;;  %v1154_v56 = vadd.f32 %v1733_v44, %v897_v48  ;;  %v2730_v27 = vadd.f32 (!%p1664_p2), %v1198_v8, %v1187_v24 }
 0x2b3   : > { %v1188_v26 = vld [vmem:[#allocation2 + $0x58] sm:$0xff] (!%p1664_p2) }
 0x2b4   : > { %1170 = vst [vmem:[#allocation2 + $0x68] sm:$0xff] %v1154_v56  ;;  %v1734_v58 = vpop.f32.mrb[28].mxu1  ;;  %v2732_v29 = vadd.f32 (!%p1664_p2), %v1198_v8, %v1188_v26  ;;  %1235 = vadd.xlane.f32.xlu0 (!%p1664_p2), %v2730_v27 }
 0x2b5   : > { %v1735_v55 = vpop.f32.mrb[29].mxu1 }
 0x2b6   : > { %v1736_v60 = vadd.f32 %v1735_v55, %v1734_v58  ;;  %v1737_v61 = vpop.f32.mrb[30].mxu1  ;;  %1176 = sbr.rel (%p1664_p2) target bundleno = 1022 (0x3fe), region = 68  ;;  %1237 = vadd.xlane.f32.xlu1 (!%p1664_p2), %v2732_v29 }
 0x2b7   : > { %v1738_v63 = vpop.f32.mrb[31].mxu1 }
 0x2b8   : > { %v1155_v0 = vadd.f32 %v1736_v60, %v898_v59  ;;  %v1739_v2 = vadd.f32 %v1738_v63, %v1737_v61 }
 0x2b9   : > { %v1189_v30 = vld [vmem:[#allocation2 + $0x60] sm:$0xff] (!%p1664_p2) }
 0x2ba   : > { %1171 = vst [vmem:[#allocation2 + $0x70] sm:$0xff] %v1155_v0  ;;  %v1156_v4 = vadd.f32 %v1739_v2, %v899_v62  ;;  %v2736_v32 = vadd.f32 (!%p1664_p2), %v1198_v8, %v1189_v30 }
 0x2bb   : > { %v1190_v31 = vld [vmem:[#allocation2 + $0x68] sm:$0xff] (!%p1664_p2) }
 0x2bc   : > { %1172 = vst [vmem:[#allocation2 + $0x78] sm:$0xff] %v1156_v4  ;;  %v2738_v33 = vadd.f32 (!%p1664_p2), %v1198_v8, %v1190_v31  ;;  %1239 = vadd.xlane.f32.xlu0 (!%p1664_p2), %v2736_v32 }
 0x2be   : > { %1241 = vadd.xlane.f32.xlu1 %v2738_v33 }
 0x2c1   : > { %v1191_v35 = vld [vmem:[#allocation2 + $0x70] sm:$0xff] }
 0x2c2   : > { %v2742_v36 = vadd.f32 %v1198_v8, %v1191_v35 }
 0x2c3   : > { %v1192_v18 = vld [vmem:[#allocation2 + $0x78] sm:$0xff] }
 0x2c4   : > { %v2744_v14 = vadd.f32 %v1198_v8, %v1192_v18  ;;  %1243 = vadd.xlane.f32.xlu0 %v2742_v36 }
 0x2c6   : > { %1245 = vadd.xlane.f32.xlu1 %v2744_v14 }
 0x321   : > { %v1216_v17 = vpop.xlane.xlu0 %1215  ;;  %v1220_v23 = vpop.xlane.xlu1 %1219 }
 0x322   : > { %v1248_v39 = vmul.f32 0.0078125, %v1216_v17  ;;  %v1250_v21 = vmul.f32 0.0078125, %v1220_v23 }
 0x324   : > { %v2748_v37 = vsub.f32 %v1199_v49, %v1248_v39  ;;  %v2750_v25 = vsub.f32 %v1201_v7, %v1250_v21 }
 0x325   : > { %v1218_v28 = vpop.xlane.xlu0 %1217  ;;  %v1222_v34 = vpop.xlane.xlu1 %1221 }
 0x326   : > { %v1249_v40 = vmul.f32 0.0078125, %v1218_v28  ;;  %v1280_v41 = vmul.f32 %v2748_v37, %v2748_v37  ;;  %v1251_v38 = vmul.f32 0.0078125, %v1222_v34  ;;  %v1282_v47 = vmul.f32 %v2750_v25, %v2750_v25 }
 0x328   : > { %v2754_v42 = vsub.f32 %v1200_v9, %v1249_v40  ;;  %1296 = vadd.xlane.f32.xlu0 %v1280_v41  ;;  %v2756_v43 = vsub.f32 %v1202_v10, %v1251_v38 }
 0x329   : > { %v1224_v48 = vpop.xlane.xlu0 %1223 }
 0x32a   : > { %v1252_v53 = vmul.f32 0.0078125, %v1224_v48  ;;  %v1281_v44 = vmul.f32 %v2754_v42, %v2754_v42  ;;  %v1283_v55 = vmul.f32 %v2756_v43, %v2756_v43 }
 0x32b   : > { %v1226_v52 = vpop.xlane.xlu1 %1225 }
 0x32c   : > { %v1253_v56 = vmul.f32 0.0078125, %v1226_v52  ;;  %v2762_v58 = vsub.f32 %v1203_v12, %v1252_v53  ;;  %1300 = vadd.xlane.f32.xlu0 %v1282_v47  ;;  %1298 = vadd.xlane.f32.xlu1 %v1281_v44 }
 0x32e   : > { %v2764_v59 = vsub.f32 %v1204_v13, %v1253_v56  ;;  %v1284_v63 = vmul.f32 %v2762_v58, %v2762_v58 }
 0x330   : > { %1302 = vadd.xlane.f32.xlu1 %v1283_v55  ;;  %1304 = vadd.xlane.f32.xlu0 %v1284_v63  ;;  %v1285_v45 = vmul.f32 %v2764_v59, %v2764_v59 }
 0x331   : > { %v1228_v60 = vpop.xlane.xlu0 %1227 }
 0x332   : > { %v1254_v62 = vmul.f32 0.0078125, %v1228_v60 }
 0x333   : > { %v1230_v61 = vpop.xlane.xlu1 %1229 }
 0x334   : > { %v1255_v0 = vmul.f32 0.0078125, %v1230_v61  ;;  %v2770_v2 = vsub.f32 %v1205_v16, %v1254_v62  ;;  %1306 = vadd.xlane.f32.xlu1 %v1285_v45 }
 0x336   : > { %v2772_v4 = vsub.f32 %v1206_v46, %v1255_v0  ;;  %v1286_v8 = vmul.f32 %v2770_v2, %v2770_v2  ;;  %v2822_v0 = vld [vmem:[%s3016_s18] ss:$0 sm:$0xff] }
 0x338   : > { %1308 = vadd.xlane.f32.xlu0 %v1286_v8  ;;  %v1287_v7 = vmul.f32 %v2772_v4, %v2772_v4 }
 0x339   : > { %v1232_v5 = vpop.xlane.xlu0 %1231 }
 0x33a   : > { %v1256_v1 = vmul.f32 0.0078125, %v1232_v5  ;;  %1310 = vadd.xlane.f32.xlu1 %v1287_v7 }
 0x33b   : > { %v1234_v57 = vpop.xlane.xlu1 %1233 }
 0x33c   : > { %v1257_v3 = vmul.f32 0.0078125, %v1234_v57  ;;  %v2778_v54 = vsub.f32 %v1207_v20, %v1256_v1 }
 0x33e   : > { %v2781_v49 = vsub.f32 %v2727_v22, %v1257_v3  ;;  %v1288_v6 = vmul.f32 %v2778_v54, %v2778_v54  ;;  %v2828_v3 = vld [vmem:[%s3017_s16] ss:$0 sm:$0xff] }
 0x340   : > { %1312 = vadd.xlane.f32.xlu0 %v1288_v6  ;;  %v1289_v15 = vmul.f32 %v2781_v49, %v2781_v49 }
 0x341   : > { %v1236_v9 = vpop.xlane.xlu0 %1235 }
 0x342   : > { %v1258_v11 = vmul.f32 0.0078125, %v1236_v9  ;;  %1314 = vadd.xlane.f32.xlu1 %v1289_v15 }
 0x343   : > { %v1238_v10 = vpop.xlane.xlu1 %1237 }
 0x344   : > { %v1259_v12 = vmul.f32 0.0078125, %v1238_v10  ;;  %v2788_v13 = vsub.f32 %v2730_v27, %v1258_v11 }
 0x346   : > { %v2791_v50 = vsub.f32 %v2732_v29, %v1259_v12  ;;  %v1290_v19 = vmul.f32 %v2788_v13, %v2788_v13 }
 0x348   : > { %1316 = vadd.xlane.f32.xlu0 %v1290_v19  ;;  %v1291_v26 = vmul.f32 %v2791_v50, %v2791_v50 }
 0x349   : > { %v1240_v16 = vpop.xlane.xlu0 %1239 }
 0x34a   : > { %v1260_v51 = vmul.f32 0.0078125, %v1240_v16  ;;  %1318 = vadd.xlane.f32.xlu1 %v1291_v26 }
 0x34b   : > { %v1242_v46 = vpop.xlane.xlu1 %1241 }
 0x34c   : > { %v1261_v20 = vmul.f32 0.0078125, %v1242_v46  ;;  %v2798_v22 = vsub.f32 %v2736_v32, %v1260_v51 }
 0x34e   : > { %v2801_v24 = vsub.f32 %v2738_v33, %v1261_v20  ;;  %v1292_v31 = vmul.f32 %v2798_v22, %v2798_v22 }
 0x350   : > { %1320 = vadd.xlane.f32.xlu0 %v1292_v31  ;;  %v1293_v33 = vmul.f32 %v2801_v24, %v2801_v24 }
 0x351   : > { %v1244_v27 = vpop.xlane.xlu0 %1243 }
 0x352   : > { %v1262_v30 = vmul.f32 0.0078125, %v1244_v27  ;;  %1322 = vadd.xlane.f32.xlu1 %v1293_v33 }
 0x353   : > { %v1246_v29 = vpop.xlane.xlu1 %1245 }
 0x354   : > { %v1263_v35 = vmul.f32 0.0078125, %v1246_v29  ;;  %v2808_v18 = vsub.f32 %v2742_v36, %v1262_v30 }
 0x356   : > { %v2811_v32 = vsub.f32 %v2744_v14, %v1263_v35  ;;  %v1294_v17 = vmul.f32 %v2808_v18, %v2808_v18 }
 0x358   : > { %1324 = vadd.xlane.f32.xlu0 %v1294_v17  ;;  %v1295_v23 = vmul.f32 %v2811_v32, %v2811_v32 }
 0x35a   : > { %1326 = vadd.xlane.f32.xlu1 %v1295_v23 }
 0x3b5   : > { %v1297_v39 = vpop.xlane.xlu0 %1296 }
 0x3b6   : > { %v1328_v36 = vmul.f32 0.0078125, %v1297_v39 }
 0x3b8   : > { %v1344_v21 = vadd.f32 1e-05, %v1328_v36 }
 0x3b9   : > { %v1299_v28 = vpop.xlane.xlu1 %1298  ;;  %v1301_v34 = vpop.xlane.xlu0 %1300 }
 0x3ba   : > { %1973 = vrsqrt.f32 %v1344_v21  ;;  %v1329_v14 = vmul.f32 0.0078125, %v1299_v28  ;;  %v1330_v40 = vmul.f32 0.0078125, %v1301_v34 }
 0x3bc   : > { %v1345_v41 = vadd.f32 1e-05, %v1329_v14  ;;  %v1346_v38 = vadd.f32 1e-05, %v1330_v40 }
 0x3bd   : > { %v1303_v47 = vpop.xlane.xlu1 %1302  ;;  %v1305_v48 = vpop.xlane.xlu0 %1304 }
 0x3be   : > { %1975 = vrsqrt.f32 %v1345_v41  ;;  %v1331_v52 = vmul.f32 0.0078125, %v1303_v47  ;;  %v1332_v53 = vmul.f32 0.0078125, %v1305_v48 }
 0x3bf   : > { %1977 = vrsqrt.f32 %v1346_v38 }
 0x3c0   : > { %v1347_v44 = vadd.f32 1e-05, %v1331_v52  ;;  %v1348_v56 = vadd.f32 1e-05, %v1332_v53 }
 0x3c1   : > { %v1307_v55 = vpop.xlane.xlu1 %1306 }
 0x3c2   : > { %1979 = vrsqrt.f32 %v1347_v44  ;;  %v1333_v61 = vmul.f32 0.0078125, %v1307_v55 }
 0x3c3   : > { %1981 = vrsqrt.f32 %v1348_v56 }
 0x3c4   : > { %v1974_v63 = vpop.eup %1973  ;;  %v1349_v45 = vadd.f32 1e-05, %v1333_v61 }
 0x3c5   : > { %v1309_v60 = vpop.xlane.xlu0 %1308  ;;  %v1376_v57 = vmul.f32 %v1974_v63, %v2748_v37 }
 0x3c6   : > { %v1334_v62 = vmul.f32 0.0078125, %v1309_v60  ;;  %1983 = vrsqrt.f32 %v1349_v45 }
 0x3c7   : > { %v1311_v1 = vpop.xlane.xlu1 %1310  ;;  %v1399_v10 = vmul.f32 %v2822_v0, %v1376_v57 }
 0x3c8   : > { %v1350_v5 = vadd.f32 1e-05, %v1334_v62  ;;  %v1335_v7 = vmul.f32 0.0078125, %v1311_v1  ;;  %v1976_v11 = vpop.eup %1975 }
 0x3c9   : > { %v1978_v15 = vpop.eup %1977  ;;  %v1422_v37 = vadd.f32 %v2828_v3, %v1399_v10  ;;  %v1377_v16 = vmul.f32 %v1976_v11, %v2754_v42 }
 0x3ca   : > { %1985 = vrsqrt.f32 %v1350_v5  ;;  %v1351_v6 = vadd.f32 1e-05, %v1335_v7  ;;  %v1378_v19 = vmul.f32 %v1978_v15, %v2750_v25 }
 0x3cb   : > { %1438 = vst [vmem:[%s2577_s5] sm:$0xff] %v1422_v37  ;;  %v1400_v27 = vmul.f32 %v2822_v0, %v1377_v16 }
 0x3cc   : > { %1987 = vrsqrt.f32 %v1351_v6  ;;  %v1980_v29 = vpop.eup %1979  ;;  %v1401_v30 = vmul.f32 %v2822_v0, %v1378_v19 }
 0x3cd   : > { %v1313_v8 = vpop.xlane.xlu0 %1312  ;;  %v1982_v33 = vpop.eup %1981  ;;  %v1423_v42 = vadd.f32 %v2828_v3, %v1400_v27  ;;  %v1379_v17 = vmul.f32 %v1980_v29, %v2756_v43 }
 0x3ce   : > { %v1336_v9 = vmul.f32 0.0078125, %v1313_v8  ;;  %v1424_v39 = vadd.f32 %v2828_v3, %v1401_v30  ;;  %v1380_v36 = vmul.f32 %v1982_v33, %v2762_v58 }
 0x3cf   : > { %v1315_v46 = vpop.xlane.xlu1 %1314  ;;  %1439 = vst [vmem:[%s2577_s5 + $0x8] sm:$0xff] %v1423_v42  ;;  %v1402_v28 = vmul.f32 %v2822_v0, %v1379_v17 }
 0x3d0   : > { %v1352_v12 = vadd.f32 1e-05, %v1336_v9  ;;  %v1337_v20 = vmul.f32 0.0078125, %v1315_v46  ;;  %v1984_v14 = vpop.eup %1983  ;;  %1440 = vst [vmem:[%s2577_s5 + $0x10] sm:$0xff] %v1424_v39  ;;  %v1403_v40 = vmul.f32 %v2822_v0, %v1380_v36 }
 0x3d1   : > { %v1425_v38 = vadd.f32 %v2828_v3, %v1402_v28  ;;  %v1381_v47 = vmul.f32 %v1984_v14, %v2764_v59 }
 0x3d2   : > { %1989 = vrsqrt.f32 %v1352_v12  ;;  %v1353_v31 = vadd.f32 1e-05, %v1337_v20  ;;  %v1426_v53 = vadd.f32 %v2828_v3, %v1403_v40 }
 0x3d3   : > { %1441 = vst [vmem:[%s2577_s5 + $0x18] sm:$0xff] %v1425_v38  ;;  %v1404_v55 = vmul.f32 %v2822_v0, %v1381_v47 }
 0x3d4   : > { %1991 = vrsqrt.f32 %v1353_v31  ;;  %v1986_v43 = vpop.eup %1985  ;;  %1442 = vst [vmem:[%s2577_s5 + $0x20] sm:$0xff] %v1426_v53 }
 0x3d5   : > { %v1317_v51 = vpop.xlane.xlu0 %1316  ;;  %v1382_v44 = vmul.f32 %v1986_v43, %v2770_v2  ;;  %v1427_v45 = vadd.f32 %v2828_v3, %v1404_v55 }
 0x3d6   : > { %v1338_v26 = vmul.f32 0.0078125, %v1317_v51  ;;  %v1988_v61 = vpop.eup %1987 }
 0x3d7   : > { %v1319_v25 = vpop.xlane.xlu1 %1318  ;;  %v1405_v59 = vmul.f32 %v2822_v0, %v1382_v44  ;;  %v1383_v5 = vmul.f32 %v1988_v61, %v2772_v4  ;;  %1443 = vst [vmem:[%s2577_s5 + $0x28] sm:$0xff] %v1427_v45 }
 0x3d8   : > { %v1354_v35 = vadd.f32 1e-05, %v1338_v26  ;;  %v1339_v21 = vmul.f32 0.0078125, %v1319_v25 }
 0x3d9   : > { %v1428_v1 = vadd.f32 %v2828_v3, %v1405_v59  ;;  %v1406_v9 = vmul.f32 %v2822_v0, %v1383_v5 }
 0x3da   : > { %1993 = vrsqrt.f32 %v1354_v35  ;;  %v1355_v41 = vadd.f32 1e-05, %v1339_v21 }
 0x3db   : > { %1444 = vst [vmem:[%s2577_s5 + $0x30] sm:$0xff] %v1428_v1  ;;  %v1429_v12 = vadd.f32 %v2828_v3, %v1406_v9 }
 0x3dc   : > { %1995 = vrsqrt.f32 %v1355_v41  ;;  %v1990_v63 = vpop.eup %1989 }
 0x3dd   : > { %v1321_v23 = vpop.xlane.xlu0 %1320  ;;  %v1384_v8 = vmul.f32 %v1990_v63, %v2778_v54  ;;  %1445 = vst [vmem:[%s2577_s5 + $0x38] sm:$0xff] %v1429_v12 }
 0x3de   : > { %v1340_v34 = vmul.f32 0.0078125, %v1321_v23  ;;  %v1992_v10 = vpop.eup %1991 }
 0x3df   : > { %v1323_v48 = vpop.xlane.xlu1 %1322  ;;  %v1407_v11 = vmul.f32 %v2822_v0, %v1384_v8  ;;  %v1385_v15 = vmul.f32 %v1992_v10, %v2781_v49 }
 0x3e0   : > { %v1356_v58 = vadd.f32 1e-05, %v1340_v34  ;;  %v1341_v56 = vmul.f32 0.0078125, %v1323_v48 }
 0x3e1   : > { %v1430_v54 = vadd.f32 %v2828_v3, %v1407_v11  ;;  %v1408_v16 = vmul.f32 %v2822_v0, %v1385_v15 }
 0x3e2   : > { %1997 = vrsqrt.f32 %v1356_v58  ;;  %v1357_v62 = vadd.f32 1e-05, %v1341_v56 }
 0x3e3   : > { %1446 = vst [vmem:[%s2577_s5 + $0x40] sm:$0xff] %v1430_v54  ;;  %v1431_v20 = vadd.f32 %v2828_v3, %v1408_v16 }
 0x3e4   : > { %1999 = vrsqrt.f32 %v1357_v62  ;;  %v1994_v4 = vpop.eup %1993 }
 0x3e5   : > { %v1325_v52 = vpop.xlane.xlu0 %1324  ;;  %v1386_v37 = vmul.f32 %v1994_v4, %v2788_v13  ;;  %1447 = vst [vmem:[%s2577_s5 + $0x48] sm:$0xff] %v1431_v20 }
 0x3e6   : > { %v1342_v60 = vmul.f32 0.0078125, %v1325_v52  ;;  %v1996_v46 = vpop.eup %1995 }
 0x3e7   : > { %v1327_v57 = vpop.xlane.xlu1 %1326  ;;  %v1409_v51 = vmul.f32 %v2822_v0, %v1386_v37  ;;  %v1387_v26 = vmul.f32 %v1996_v46, %v2791_v50 }
 0x3e8   : > { %v1358_v2 = vadd.f32 1e-05, %v1342_v60  ;;  %v1343_v7 = vmul.f32 0.0078125, %v1327_v57 }
 0x3e9   : > { %v1432_v49 = vadd.f32 %v2828_v3, %v1409_v51  ;;  %v1410_v13 = vmul.f32 %v2822_v0, %v1387_v26 }
 0x3ea   : > { %2001 = vrsqrt.f32 %v1358_v2  ;;  %v1359_v6 = vadd.f32 1e-05, %v1343_v7 }
 0x3eb   : > { %1448 = vst [vmem:[%s2577_s5 + $0x50] sm:$0xff] %v1432_v49  ;;  %v1433_v35 = vadd.f32 %v2828_v3, %v1410_v13 }
 0x3ec   : > { %2003 = vrsqrt.f32 %v1359_v6  ;;  %v1998_v19 = vpop.eup %1997 }
 0x3ed   : > { %v1388_v27 = vmul.f32 %v1998_v19, %v2798_v22  ;;  %1449 = vst [vmem:[%s2577_s5 + $0x58] sm:$0xff] %v1433_v35 }
 0x3ee   : > { %v2000_v29 = vpop.eup %1999 }
 0x3ef   : > { %v1411_v30 = vmul.f32 %v2822_v0, %v1388_v27  ;;  %v1389_v50 = vmul.f32 %v2000_v29, %v2801_v24 }
 0x3f1   : > { %v1434_v33 = vadd.f32 %v2828_v3, %v1411_v30  ;;  %v1412_v22 = vmul.f32 %v2822_v0, %v1389_v50 }
 0x3f3   : > { %1450 = vst [vmem:[%s2577_s5 + $0x60] sm:$0xff] %v1434_v33  ;;  %v1435_v23 = vadd.f32 %v2828_v3, %v1412_v22 }
 0x3f4   : > { %v2002_v31 = vpop.eup %2001 }
 0x3f5   : > { %v1390_v42 = vmul.f32 %v2002_v31, %v2808_v18  ;;  %1451 = vst [vmem:[%s2577_s5 + $0x68] sm:$0xff] %v1435_v23 }
 0x3f6   : > { %v2004_v17 = vpop.eup %2003 }
 0x3f7   : > { %v1413_v25 = vmul.f32 %v2822_v0, %v1390_v42  ;;  %v1391_v39 = vmul.f32 %v2004_v17, %v2811_v32 }
 0x3f9   : > { %v1436_v36 = vadd.f32 %v2828_v3, %v1413_v25  ;;  %v1414_v24 = vmul.f32 %v2822_v0, %v1391_v39 }
 0x3fb   : > { %1452 = vst [vmem:[%s2577_s5 + $0x70] sm:$0xff] %v1436_v36  ;;  %v1437_v21 = vadd.f32 %v2828_v3, %v1414_v24 }
 0x3fd   : > { %1453 = vst [vmem:[%s2577_s5 + $0x78] sm:$0xff] %v1437_v21 }
 0x3fe PF: > { %s3018_s8 = sld [smem:[#allocation15_spill]]  ;;  %s1468_s1 = sshll.u32 %s2577_s5, 4  ;;  %s2900_s1 = int_to_ptr.vmem [resolvable:$true] %s1468_s1 }
 0x3ff   : > { %s3019_s13 = sld [smem:[#allocation25_spill]]  ;;  %s1455_s17 = scalar_lea.sflag [#allocation5], %s2549_s29 }
 0x400   : > { %s2095_s23 = scalar_lea.vmem %s2900_s1, 2048  ;;  %p3020_p11 = scmp.ne.s32.totalorder %s3005_s21, 0 }
 0x401   : > { %p2096_p13 = scmp.ne.s32.totalorder %s2900_s1, %s2095_s23  ;;  %s2233_s26 = smov [#allocation9]  }
 0x402   : > { %s2099_s22 = sshll.u32 %s2233_s26, 4  ;;  %s2100_s22 = int_to_ptr.vmem [resolvable:$false] %s2099_s22 }
 0x403   : > { %p2097_p6 = pnand %p2096_p13, %p3020_p11  ;;  %s2101_s24 = scalar_lea.vmem %s2100_s22, 4096 }
 0x404   : > { %s1675_s4 = sshll.u32 %s3018_s8, 11  ;;  %p2102_p1 = scmp.lt.s32.totalorder %s2900_s1, %s2100_s22 }
 0x405   : > { %s2897_s12 = scalar_lea.hbm %s3019_s13, %s1675_s4  ;;  %p2098_p5 = pneg %p2097_p6 }
 0x406   : > { %p2103_p0 = scmp.lt.s32.totalorder %s2101_s24, %s2095_s23 }
 0x408   : > { %p2104_p9 = por %p2103_p0, %p2102_p1 }
 0x40a   : > { %p2105_p12 = pnand %p2104_p9, %p2098_p5 }
 0x40c   : > { %2108 = shalt.err (!%p2105_p12)
}
 0x40d   : > { %s2109_s5 = scalar_lea.hbm %s2897_s12, 2048  ;;  %s2113_s19 = scalar_lea.hbm %s3019_s13, 4096 }
 0x40e   : > { %p2110_p3 = scmp.ne.s32.totalorder %s2897_s12, %s2109_s5  ;;  %p2114_p8 = scmp.lt.u32.totalorder %s2897_s12, %s3019_s13 }
 0x40f   : > { %p2115_p10 = scmp.lt.u32.totalorder %s2113_s19, %s2109_s5  ;;  %p2117_p13 = scmp.lt.u32.totalorder %s2109_s5, %s2897_s12 }
 0x410   : > { %p2111_p4 = pnand %p2110_p3, %p3020_p11 }
 0x411   : > { %p2116_p2 = por %p2115_p10, %p2114_p8 }
 0x412   : > { %p2112_p7 = pneg %p2111_p4 }
 0x413   : > { %p2118_p6 = por %p2117_p13, %p2116_p2 }
 0x415   : > { %p2119_p5 = pnand %p2118_p6, %p2112_p7 }
 0x417   : > { %2122 = shalt.err (!%p2119_p5)
}
 0x418   : > { %s2234_s14 = smov 128   ;;  %s2235_s16 = smov 8  }
 0x419   : > { %1746 = dma.vmem_to_hbm [thread:$0]  (%p3020_p11), %s2900_s1, 2048, %s2897_s12, %s1455_s17, %s2234_s14, %s2234_s14, %s2235_s16  }
 0x41a PF: > { %p1763_p1 = scmp.ge.s32.totalorder %s2221_s11, 2  ;;  %s1483_s8 = sand.u32 1, %s2193_s27  }
 0x41b   : > { %p3021_p0 = scmp.ne.s32.totalorder %s3007_s6, 0  ;;  %s1484_s4 = scalar_lea.sflag [#allocation5], %s1483_s8 }
 0x41d   : > { %p1759_p9 = pnand %p1763_p1, %p3021_p0 }
 0x41f   : > { %2176 = dma.done.wait (!%p1759_p9), %s1484_s4, 2048  }
 0x420   : > { %2178 = vsyncadd (!%p1759_p9), %s1484_s4, 4294965248  ;;  %s26_s11 = sadd.s32 1, %s2221_s11   ;;  %s3022_s7 = sld [smem:[#allocation13_spill]] }
 0x421   : > { %p23_p12 = scmp.ge.s32.totalorder %s26_s11, 6   ;;  %s3023_s26 = sld [smem:[#allocation18_spill]] }
 0x422   : > { %s3024_s21 = sld [smem:[#allocation14_spill]]  ;;  %s3025_s29 = sld [smem:[#allocation20_spill]] }
 0x423   : > { %s3026_s8 = sld [smem:[#allocation16_spill]]  ;;  %s3027_s20 = sld [smem:[#allocation17_spill]] }
 0x424   : > { %s3028_s10 = sld [smem:[#allocation19_spill]]  ;;  %s3029_s24 = smov %s2185_s25 }
 0x425   : > { %s3031_s27 = smov %s2197_s28  ;;  %s3033_s30 = smov %s2213_s9 }
 0x426   : > { %s3030_s25 = smov %s3022_s7  ;;  %25 = sbr.rel (!%p23_p12) target bundleno = 17 (0x11), region = 128 }
 0x428   : > { %s3032_s28 = smov %s3024_s21 }
 0x429   : > { %s3034_s9 = smov %s3027_s20 }
 0x42d   :  { %1489 = vsyncpa [#allocation4], 1 }
 0x42e   :  { %1491 = vsyncpa [#allocation4 + $0x1], 1 }
 0x42f   :  { %1492 = vsyncpa [#allocation7], 1 }
 0x430   :  { %1494 = vsyncpa [#allocation7 + $0x1], 1 }
 0x431   :  { %1495 = vsyncpa [#allocation5], 1 }
 0x432   :  { %1497 = vsyncpa [#allocation5 + $0x1], 1 }

</bundles_post_ra>
